<compile_context>
chip_gen: v6e
topology: v6e:2x2x1
jax: 0.10.0
libtpu: 0.0.40
codegen_flags: <defaults>
</compile_context>

<pallas_src>
import jax
import jax.numpy as jnp
from jax.experimental import pallas as pl
from jax.experimental.pallas import tpu as pltpu


def neural_ode_kernel(dt_ref, hdt_ref, dt6_ref,      # SMEM, (T-1,) per-step scalars
                      x0_ref,                        # VMEM, (B, 1) initial state
                      w1_ref, b1_ref,                # VMEM, (1, H) fc1 weight / bias rows
                      w2_ref, b2_ref,                # VMEM, (1, H) fc2 weight row, (1, 1) bias
                      out_ref):                      # VMEM, (B, T) trajectory
    B, T = out_ref.shape

    # Single-vreg, lane-dense weight rows; loaded once, splat at use.
    w1 = w1_ref[...]                                 # [1, H]
    b1 = b1_ref[...]                                 # [1, H]
    w2 = w2_ref[...]                                 # [1, H]
    b2 = b2_ref[...]                                 # [1, 1]

    def ode_func(x):                                 # x: [B, 1]
        # fc1: single input feature -> lane-dense broadcast multiply-add (VPU).
        h = jnp.maximum(x * w1 + b1, 0.0)            # [B, H], one vreg
        # fc2: single output feature -> elementwise mul + cross-lane reduce (XLU).
        return jnp.sum(w2 * h, axis=1, keepdims=True) + b2   # [B, 1]

    x = x0_ref[...]                                  # [B, 1]
    xs = [x]

    # Fully unrolled static time loop (T is small and known at trace time).
    for i in range(T - 1):
        dt = dt_ref[i]                               # scalars from SMEM
        hdt = hdt_ref[i]
        dt6 = dt6_ref[i]
        k1 = ode_func(x)
        k2 = ode_func(x + hdt * k1)
        k3 = ode_func(x + hdt * k2)
        k4 = ode_func(x + dt * k3)
        x = x + dt6 * (k1 + 2.0 * k2 + 2.0 * k3 + k4)
        xs.append(x)

    # Single store of the whole trajectory (batch on sublanes, time on lanes).
    out_ref[...] = jnp.concatenate(xs, axis=1)       # [B, T]


def neural_ode(x0, t, w1, b1, w2, b2):
    """NeuralODE forward.

    x0: [B, 1] initial states, t: [T] time grid.
    Parameters in PyTorch nn.Linear layout:
      w1 = fc1.weight [H, 1], b1 = fc1.bias [H],
      w2 = fc2.weight [1, H], b2 = fc2.bias [1].
    Returns the trajectory [T, B, 1] (time leading, like torchdiffeq.odeint).
    """
    B = x0.shape[0]
    T = t.shape[0]
    H = w1.shape[0]

    x0_f = x0.reshape(B, 1).astype(jnp.float32)        # batch on sublanes
    w1_row = w1.reshape(1, H).astype(jnp.float32)      # lane-dense weight rows
    b1_row = b1.reshape(1, H).astype(jnp.float32)
    w2_row = w2.reshape(1, H).astype(jnp.float32)
    b2_11 = b2.reshape(1, 1).astype(jnp.float32)

    if T < 2:
        return x0_f.reshape(1, B, 1)

    # Precompute per-step scalars on host/XLA; kernel only reads them from SMEM.
    t_f = t.astype(jnp.float32)
    dt = t_f[1:] - t_f[:-1]                            # (T-1,)
    hdt = 0.5 * dt
    dt6 = dt / 6.0

    out = pl.pallas_call(
        neural_ode_kernel,
        out_shape=jax.ShapeDtypeStruct((B, T), jnp.float32),
        in_specs=[
            pl.BlockSpec(memory_space=pltpu.MemorySpace.SMEM),   # dt
            pl.BlockSpec(memory_space=pltpu.MemorySpace.SMEM),   # 0.5*dt
            pl.BlockSpec(memory_space=pltpu.MemorySpace.SMEM),   # dt/6
            pl.BlockSpec(memory_space=pltpu.MemorySpace.VMEM),   # x0 (B,1)
            pl.BlockSpec(memory_space=pltpu.MemorySpace.VMEM),   # w1 (1,H)
            pl.BlockSpec(memory_space=pltpu.MemorySpace.VMEM),   # b1 (1,H)
            pl.BlockSpec(memory_space=pltpu.MemorySpace.VMEM),   # w2 (1,H)
            pl.BlockSpec(memory_space=pltpu.MemorySpace.VMEM),   # b2 (1,1)
        ],
        out_specs=pl.BlockSpec(memory_space=pltpu.MemorySpace.VMEM),
    )(dt, hdt, dt6, x0_f, w1_row, b1_row, w2_row, b2_11)

    # [B, T] -> [T, B, 1] (time leading, like torchdiffeq.odeint).
    return jnp.transpose(out, (1, 0)).reshape(T, B, 1)


def neural_ode_ref(x0, t, w1, b1, w2, b2):
    """Pure-JAX reference (same fixed-step RK4 scheme), PyTorch param layout."""
    def f(x):                                        # x: [B, 1]
        h = jnp.maximum(x @ w1.T + b1, 0.0)          # [B, H]
        return h @ w2.T + b2                         # [B, 1]

    def step(x, dt):
        k1 = f(x)
        k2 = f(x + 0.5 * dt * k1)
        k3 = f(x + 0.5 * dt * k2)
        k4 = f(x + dt * k3)
        return x + (dt / 6.0) * (k1 + 2.0 * k2 + 2.0 * k3 + k4)

    xs = [x0]
    x = x0
    for i in range(t.shape[0] - 1):
        x = step(x, t[i + 1] - t[i])
        xs.append(x)
    return jnp.stack(xs, axis=0)


if __name__ == "__main__":
    key = jax.random.PRNGKey(0)
    k1, k2, k3, k4, k5 = jax.random.split(key, 5)

    B = 2          # batch of initial conditions
    H = 50         # hidden width of ODEFunc (Linear(1, 50) -> Linear(50, 1))
    T = 8          # number of time points

    # PyTorch nn.Linear-shaped parameters (uniform(-1/sqrt(fan_in), +1/sqrt(fan_in))).
    w1 = jax.random.uniform(k1, (H, 1), jnp.float32, -1.0, 1.0)        # fc1.weight, fan_in = 1
    b1 = jax.random.uniform(k2, (H,), jnp.float32, -1.0, 1.0)          # fc1.bias
    bound2 = 1.0 / (H ** 0.5)
    w2 = jax.random.uniform(k3, (1, H), jnp.float32, -bound2, bound2)  # fc2.weight
    b2 = jax.random.uniform(k4, (1,), jnp.float32, -bound2, bound2)    # fc2.bias

    # Initial state x0 (torch example uses [[0.0]]; we use a small batch of 2).
    x0 = jax.random.normal(k5, (B, 1), jnp.float32) * 0.1
    t = jnp.linspace(0.0, 1.0, T, dtype=jnp.float32)

    out = neural_ode(x0, t, w1, b1, w2, b2)
    out = jax.block_until_ready(out)

    ref = neural_ode_ref(x0, t, w1, b1, w2, b2)
    assert out.shape == (T, B, 1)
    assert jnp.allclose(out, ref, atol=1e-5, rtol=1e-5), "mismatch vs JAX reference"

    print("KERNEL_OK")
</pallas_src>

<mosaic_0001>
module attributes {stable_mosaic.version = 11 : i64} {
  func.func @neural_ode_kernel(%arg0: memref<7xf32, #tpu.memory_space<smem>>, %arg1: memref<7xf32, #tpu.memory_space<smem>>, %arg2: memref<7xf32, #tpu.memory_space<smem>>, %arg3: memref<2x1xf32, #tpu.memory_space<vmem>>, %arg4: memref<1x50xf32, #tpu.memory_space<vmem>>, %arg5: memref<1x50xf32, #tpu.memory_space<vmem>>, %arg6: memref<1x50xf32, #tpu.memory_space<vmem>>, %arg7: memref<1x1xf32, #tpu.memory_space<vmem>>, %arg8: memref<2x8xf32, #tpu.memory_space<vmem>>) attributes {dimension_semantics = [], scalar_prefetch = 0 : i64, scratch_operands = 0 : i64, tpu.core_type = #tpu.core_type<tc>} {
    %c0 = arith.constant 0 : index
    %c0_0 = arith.constant 0 : index
    %0 = vector.load %arg4[%c0, %c0_0] : memref<1x50xf32, #tpu.memory_space<vmem>>, vector<1x50xf32>
    %c0_1 = arith.constant 0 : index
    %c0_2 = arith.constant 0 : index
    %1 = vector.load %arg5[%c0_1, %c0_2] : memref<1x50xf32, #tpu.memory_space<vmem>>, vector<1x50xf32>
    %c0_3 = arith.constant 0 : index
    %c0_4 = arith.constant 0 : index
    %2 = vector.load %arg6[%c0_3, %c0_4] : memref<1x50xf32, #tpu.memory_space<vmem>>, vector<1x50xf32>
    %c0_5 = arith.constant 0 : index
    %c0_6 = arith.constant 0 : index
    %3 = vector.load %arg7[%c0_5, %c0_6] : memref<1x1xf32, #tpu.memory_space<vmem>>, vector<1x1xf32>
    %c0_7 = arith.constant 0 : index
    %c0_8 = arith.constant 0 : index
    %4 = vector.load %arg3[%c0_7, %c0_8] : memref<2x1xf32, #tpu.memory_space<vmem>>, vector<2x1xf32>
    %c0_9 = arith.constant 0 : index
    %5 = memref.load %arg0[%c0_9] : memref<7xf32, #tpu.memory_space<smem>>
    %c0_10 = arith.constant 0 : index
    %6 = memref.load %arg1[%c0_10] : memref<7xf32, #tpu.memory_space<smem>>
    %c0_11 = arith.constant 0 : index
    %7 = memref.load %arg2[%c0_11] : memref<7xf32, #tpu.memory_space<smem>>
    %8 = vector.broadcast %4 : vector<2x1xf32> to vector<2x50xf32>
    %9 = vector.broadcast %0 : vector<1x50xf32> to vector<2x50xf32>
    %10 = arith.mulf %8, %9 : vector<2x50xf32>
    %11 = vector.broadcast %1 : vector<1x50xf32> to vector<2x50xf32>
    %12 = arith.addf %10, %11 : vector<2x50xf32>
    %cst = arith.constant 0.000000e+00 : f32
    %13 = vector.broadcast %cst : f32 to vector<2x50xf32>
    %14 = arith.maximumf %12, %13 : vector<2x50xf32>
    %15 = vector.broadcast %2 : vector<1x50xf32> to vector<2x50xf32>
    %16 = arith.mulf %15, %14 : vector<2x50xf32>
    %cst_12 = arith.constant dense<0.000000e+00> : vector<2xf32>
    %17 = vector.multi_reduction <add>, %16, %cst_12 [1] : vector<2x50xf32> to vector<2xf32>
    %18 = vector.shape_cast %17 : vector<2xf32> to vector<2x1xf32>
    %19 = vector.broadcast %3 : vector<1x1xf32> to vector<2x1xf32>
    %20 = arith.addf %18, %19 : vector<2x1xf32>
    %21 = vector.broadcast %6 : f32 to vector<2x1xf32>
    %22 = arith.mulf %21, %20 : vector<2x1xf32>
    %23 = arith.addf %4, %22 : vector<2x1xf32>
    %24 = vector.broadcast %23 : vector<2x1xf32> to vector<2x50xf32>
    %25 = vector.broadcast %0 : vector<1x50xf32> to vector<2x50xf32>
    %26 = arith.mulf %24, %25 : vector<2x50xf32>
    %27 = vector.broadcast %1 : vector<1x50xf32> to vector<2x50xf32>
    %28 = arith.addf %26, %27 : vector<2x50xf32>
    %cst_13 = arith.constant 0.000000e+00 : f32
    %29 = vector.broadcast %cst_13 : f32 to vector<2x50xf32>
    %30 = arith.maximumf %28, %29 : vector<2x50xf32>
    %31 = vector.broadcast %2 : vector<1x50xf32> to vector<2x50xf32>
    %32 = arith.mulf %31, %30 : vector<2x50xf32>
    %cst_14 = arith.constant dense<0.000000e+00> : vector<2xf32>
    %33 = vector.multi_reduction <add>, %32, %cst_14 [1] : vector<2x50xf32> to vector<2xf32>
    %34 = vector.shape_cast %33 : vector<2xf32> to vector<2x1xf32>
    %35 = vector.broadcast %3 : vector<1x1xf32> to vector<2x1xf32>
    %36 = arith.addf %34, %35 : vector<2x1xf32>
    %37 = vector.broadcast %6 : f32 to vector<2x1xf32>
    %38 = arith.mulf %37, %36 : vector<2x1xf32>
    %39 = arith.addf %4, %38 : vector<2x1xf32>
    %40 = vector.broadcast %39 : vector<2x1xf32> to vector<2x50xf32>
    %41 = vector.broadcast %0 : vector<1x50xf32> to vector<2x50xf32>
    %42 = arith.mulf %40, %41 : vector<2x50xf32>
    %43 = vector.broadcast %1 : vector<1x50xf32> to vector<2x50xf32>
    %44 = arith.addf %42, %43 : vector<2x50xf32>
    %cst_15 = arith.constant 0.000000e+00 : f32
    %45 = vector.broadcast %cst_15 : f32 to vector<2x50xf32>
    %46 = arith.maximumf %44, %45 : vector<2x50xf32>
    %47 = vector.broadcast %2 : vector<1x50xf32> to vector<2x50xf32>
    %48 = arith.mulf %47, %46 : vector<2x50xf32>
    %cst_16 = arith.constant dense<0.000000e+00> : vector<2xf32>
    %49 = vector.multi_reduction <add>, %48, %cst_16 [1] : vector<2x50xf32> to vector<2xf32>
    %50 = vector.shape_cast %49 : vector<2xf32> to vector<2x1xf32>
    %51 = vector.broadcast %3 : vector<1x1xf32> to vector<2x1xf32>
    %52 = arith.addf %50, %51 : vector<2x1xf32>
    %53 = vector.broadcast %5 : f32 to vector<2x1xf32>
    %54 = arith.mulf %53, %52 : vector<2x1xf32>
    %55 = arith.addf %4, %54 : vector<2x1xf32>
    %56 = vector.broadcast %55 : vector<2x1xf32> to vector<2x50xf32>
    %57 = vector.broadcast %0 : vector<1x50xf32> to vector<2x50xf32>
    %58 = arith.mulf %56, %57 : vector<2x50xf32>
    %59 = vector.broadcast %1 : vector<1x50xf32> to vector<2x50xf32>
    %60 = arith.addf %58, %59 : vector<2x50xf32>
    %cst_17 = arith.constant 0.000000e+00 : f32
    %61 = vector.broadcast %cst_17 : f32 to vector<2x50xf32>
    %62 = arith.maximumf %60, %61 : vector<2x50xf32>
    %63 = vector.broadcast %2 : vector<1x50xf32> to vector<2x50xf32>
    %64 = arith.mulf %63, %62 : vector<2x50xf32>
    %cst_18 = arith.constant dense<0.000000e+00> : vector<2xf32>
    %65 = vector.multi_reduction <add>, %64, %cst_18 [1] : vector<2x50xf32> to vector<2xf32>
    %66 = vector.shape_cast %65 : vector<2xf32> to vector<2x1xf32>
    %67 = vector.broadcast %3 : vector<1x1xf32> to vector<2x1xf32>
    %68 = arith.addf %66, %67 : vector<2x1xf32>
    %cst_19 = arith.constant 2.000000e+00 : f32
    %69 = vector.broadcast %cst_19 : f32 to vector<2x1xf32>
    %70 = arith.mulf %69, %36 : vector<2x1xf32>
    %71 = arith.addf %20, %70 : vector<2x1xf32>
    %cst_20 = arith.constant 2.000000e+00 : f32
    %72 = vector.broadcast %cst_20 : f32 to vector<2x1xf32>
    %73 = arith.mulf %72, %52 : vector<2x1xf32>
    %74 = arith.addf %71, %73 : vector<2x1xf32>
    %75 = arith.addf %74, %68 : vector<2x1xf32>
    %76 = vector.broadcast %7 : f32 to vector<2x1xf32>
    %77 = arith.mulf %76, %75 : vector<2x1xf32>
    %78 = arith.addf %4, %77 : vector<2x1xf32>
    %c1 = arith.constant 1 : index
    %79 = memref.load %arg0[%c1] : memref<7xf32, #tpu.memory_space<smem>>
    %c1_21 = arith.constant 1 : index
    %80 = memref.load %arg1[%c1_21] : memref<7xf32, #tpu.memory_space<smem>>
    %c1_22 = arith.constant 1 : index
    %81 = memref.load %arg2[%c1_22] : memref<7xf32, #tpu.memory_space<smem>>
    %82 = vector.broadcast %78 : vector<2x1xf32> to vector<2x50xf32>
    %83 = vector.broadcast %0 : vector<1x50xf32> to vector<2x50xf32>
    %84 = arith.mulf %82, %83 : vector<2x50xf32>
    %85 = vector.broadcast %1 : vector<1x50xf32> to vector<2x50xf32>
    %86 = arith.addf %84, %85 : vector<2x50xf32>
    %cst_23 = arith.constant 0.000000e+00 : f32
    %87 = vector.broadcast %cst_23 : f32 to vector<2x50xf32>
    %88 = arith.maximumf %86, %87 : vector<2x50xf32>
    %89 = vector.broadcast %2 : vector<1x50xf32> to vector<2x50xf32>
    %90 = arith.mulf %89, %88 : vector<2x50xf32>
    %cst_24 = arith.constant dense<0.000000e+00> : vector<2xf32>
    %91 = vector.multi_reduction <add>, %90, %cst_24 [1] : vector<2x50xf32> to vector<2xf32>
    %92 = vector.shape_cast %91 : vector<2xf32> to vector<2x1xf32>
    %93 = vector.broadcast %3 : vector<1x1xf32> to vector<2x1xf32>
    %94 = arith.addf %92, %93 : vector<2x1xf32>
    %95 = vector.broadcast %80 : f32 to vector<2x1xf32>
    %96 = arith.mulf %95, %94 : vector<2x1xf32>
    %97 = arith.addf %78, %96 : vector<2x1xf32>
    %98 = vector.broadcast %97 : vector<2x1xf32> to vector<2x50xf32>
    %99 = vector.broadcast %0 : vector<1x50xf32> to vector<2x50xf32>
    %100 = arith.mulf %98, %99 : vector<2x50xf32>
    %101 = vector.broadcast %1 : vector<1x50xf32> to vector<2x50xf32>
    %102 = arith.addf %100, %101 : vector<2x50xf32>
    %cst_25 = arith.constant 0.000000e+00 : f32
    %103 = vector.broadcast %cst_25 : f32 to vector<2x50xf32>
    %104 = arith.maximumf %102, %103 : vector<2x50xf32>
    %105 = vector.broadcast %2 : vector<1x50xf32> to vector<2x50xf32>
    %106 = arith.mulf %105, %104 : vector<2x50xf32>
    %cst_26 = arith.constant dense<0.000000e+00> : vector<2xf32>
    %107 = vector.multi_reduction <add>, %106, %cst_26 [1] : vector<2x50xf32> to vector<2xf32>
    %108 = vector.shape_cast %107 : vector<2xf32> to vector<2x1xf32>
    %109 = vector.broadcast %3 : vector<1x1xf32> to vector<2x1xf32>
    %110 = arith.addf %108, %109 : vector<2x1xf32>
    %111 = vector.broadcast %80 : f32 to vector<2x1xf32>
    %112 = arith.mulf %111, %110 : vector<2x1xf32>
    %113 = arith.addf %78, %112 : vector<2x1xf32>
    %114 = vector.broadcast %113 : vector<2x1xf32> to vector<2x50xf32>
    %115 = vector.broadcast %0 : vector<1x50xf32> to vector<2x50xf32>
    %116 = arith.mulf %114, %115 : vector<2x50xf32>
    %117 = vector.broadcast %1 : vector<1x50xf32> to vector<2x50xf32>
    %118 = arith.addf %116, %117 : vector<2x50xf32>
    %cst_27 = arith.constant 0.000000e+00 : f32
    %119 = vector.broadcast %cst_27 : f32 to vector<2x50xf32>
    %120 = arith.maximumf %118, %119 : vector<2x50xf32>
    %121 = vector.broadcast %2 : vector<1x50xf32> to vector<2x50xf32>
    %122 = arith.mulf %121, %120 : vector<2x50xf32>
    %cst_28 = arith.constant dense<0.000000e+00> : vector<2xf32>
    %123 = vector.multi_reduction <add>, %122, %cst_28 [1] : vector<2x50xf32> to vector<2xf32>
    %124 = vector.shape_cast %123 : vector<2xf32> to vector<2x1xf32>
    %125 = vector.broadcast %3 : vector<1x1xf32> to vector<2x1xf32>
    %126 = arith.addf %124, %125 : vector<2x1xf32>
    %127 = vector.broadcast %79 : f32 to vector<2x1xf32>
    %128 = arith.mulf %127, %126 : vector<2x1xf32>
    %129 = arith.addf %78, %128 : vector<2x1xf32>
    %130 = vector.broadcast %129 : vector<2x1xf32> to vector<2x50xf32>
    %131 = vector.broadcast %0 : vector<1x50xf32> to vector<2x50xf32>
    %132 = arith.mulf %130, %131 : vector<2x50xf32>
    %133 = vector.broadcast %1 : vector<1x50xf32> to vector<2x50xf32>
    %134 = arith.addf %132, %133 : vector<2x50xf32>
    %cst_29 = arith.constant 0.000000e+00 : f32
    %135 = vector.broadcast %cst_29 : f32 to vector<2x50xf32>
    %136 = arith.maximumf %134, %135 : vector<2x50xf32>
    %137 = vector.broadcast %2 : vector<1x50xf32> to vector<2x50xf32>
    %138 = arith.mulf %137, %136 : vector<2x50xf32>
    %cst_30 = arith.constant dense<0.000000e+00> : vector<2xf32>
    %139 = vector.multi_reduction <add>, %138, %cst_30 [1] : vector<2x50xf32> to vector<2xf32>
    %140 = vector.shape_cast %139 : vector<2xf32> to vector<2x1xf32>
    %141 = vector.broadcast %3 : vector<1x1xf32> to vector<2x1xf32>
    %142 = arith.addf %140, %141 : vector<2x1xf32>
    %cst_31 = arith.constant 2.000000e+00 : f32
    %143 = vector.broadcast %cst_31 : f32 to vector<2x1xf32>
    %144 = arith.mulf %143, %110 : vector<2x1xf32>
    %145 = arith.addf %94, %144 : vector<2x1xf32>
    %cst_32 = arith.constant 2.000000e+00 : f32
    %146 = vector.broadcast %cst_32 : f32 to vector<2x1xf32>
    %147 = arith.mulf %146, %126 : vector<2x1xf32>
    %148 = arith.addf %145, %147 : vector<2x1xf32>
    %149 = arith.addf %148, %142 : vector<2x1xf32>
    %150 = vector.broadcast %81 : f32 to vector<2x1xf32>
    %151 = arith.mulf %150, %149 : vector<2x1xf32>
    %152 = arith.addf %78, %151 : vector<2x1xf32>
    %c2 = arith.constant 2 : index
    %153 = memref.load %arg0[%c2] : memref<7xf32, #tpu.memory_space<smem>>
    %c2_33 = arith.constant 2 : index
    %154 = memref.load %arg1[%c2_33] : memref<7xf32, #tpu.memory_space<smem>>
    %c2_34 = arith.constant 2 : index
    %155 = memref.load %arg2[%c2_34] : memref<7xf32, #tpu.memory_space<smem>>
    %156 = vector.broadcast %152 : vector<2x1xf32> to vector<2x50xf32>
    %157 = vector.broadcast %0 : vector<1x50xf32> to vector<2x50xf32>
    %158 = arith.mulf %156, %157 : vector<2x50xf32>
    %159 = vector.broadcast %1 : vector<1x50xf32> to vector<2x50xf32>
    %160 = arith.addf %158, %159 : vector<2x50xf32>
    %cst_35 = arith.constant 0.000000e+00 : f32
    %161 = vector.broadcast %cst_35 : f32 to vector<2x50xf32>
    %162 = arith.maximumf %160, %161 : vector<2x50xf32>
    %163 = vector.broadcast %2 : vector<1x50xf32> to vector<2x50xf32>
    %164 = arith.mulf %163, %162 : vector<2x50xf32>
    %cst_36 = arith.constant dense<0.000000e+00> : vector<2xf32>
    %165 = vector.multi_reduction <add>, %164, %cst_36 [1] : vector<2x50xf32> to vector<2xf32>
    %166 = vector.shape_cast %165 : vector<2xf32> to vector<2x1xf32>
    %167 = vector.broadcast %3 : vector<1x1xf32> to vector<2x1xf32>
    %168 = arith.addf %166, %167 : vector<2x1xf32>
    %169 = vector.broadcast %154 : f32 to vector<2x1xf32>
    %170 = arith.mulf %169, %168 : vector<2x1xf32>
    %171 = arith.addf %152, %170 : vector<2x1xf32>
    %172 = vector.broadcast %171 : vector<2x1xf32> to vector<2x50xf32>
    %173 = vector.broadcast %0 : vector<1x50xf32> to vector<2x50xf32>
    %174 = arith.mulf %172, %173 : vector<2x50xf32>
    %175 = vector.broadcast %1 : vector<1x50xf32> to vector<2x50xf32>
    %176 = arith.addf %174, %175 : vector<2x50xf32>
    %cst_37 = arith.constant 0.000000e+00 : f32
    %177 = vector.broadcast %cst_37 : f32 to vector<2x50xf32>
    %178 = arith.maximumf %176, %177 : vector<2x50xf32>
    %179 = vector.broadcast %2 : vector<1x50xf32> to vector<2x50xf32>
    %180 = arith.mulf %179, %178 : vector<2x50xf32>
    %cst_38 = arith.constant dense<0.000000e+00> : vector<2xf32>
    %181 = vector.multi_reduction <add>, %180, %cst_38 [1] : vector<2x50xf32> to vector<2xf32>
    %182 = vector.shape_cast %181 : vector<2xf32> to vector<2x1xf32>
    %183 = vector.broadcast %3 : vector<1x1xf32> to vector<2x1xf32>
    %184 = arith.addf %182, %183 : vector<2x1xf32>
    %185 = vector.broadcast %154 : f32 to vector<2x1xf32>
    %186 = arith.mulf %185, %184 : vector<2x1xf32>
    %187 = arith.addf %152, %186 : vector<2x1xf32>
    %188 = vector.broadcast %187 : vector<2x1xf32> to vector<2x50xf32>
    %189 = vector.broadcast %0 : vector<1x50xf32> to vector<2x50xf32>
    %190 = arith.mulf %188, %189 : vector<2x50xf32>
    %191 = vector.broadcast %1 : vector<1x50xf32> to vector<2x50xf32>
    %192 = arith.addf %190, %191 : vector<2x50xf32>
    %cst_39 = arith.constant 0.000000e+00 : f32
    %193 = vector.broadcast %cst_39 : f32 to vector<2x50xf32>
    %194 = arith.maximumf %192, %193 : vector<2x50xf32>
    %195 = vector.broadcast %2 : vector<1x50xf32> to vector<2x50xf32>
    %196 = arith.mulf %195, %194 : vector<2x50xf32>
    %cst_40 = arith.constant dense<0.000000e+00> : vector<2xf32>
    %197 = vector.multi_reduction <add>, %196, %cst_40 [1] : vector<2x50xf32> to vector<2xf32>
    %198 = vector.shape_cast %197 : vector<2xf32> to vector<2x1xf32>
    %199 = vector.broadcast %3 : vector<1x1xf32> to vector<2x1xf32>
    %200 = arith.addf %198, %199 : vector<2x1xf32>
    %201 = vector.broadcast %153 : f32 to vector<2x1xf32>
    %202 = arith.mulf %201, %200 : vector<2x1xf32>
    %203 = arith.addf %152, %202 : vector<2x1xf32>
    %204 = vector.broadcast %203 : vector<2x1xf32> to vector<2x50xf32>
    %205 = vector.broadcast %0 : vector<1x50xf32> to vector<2x50xf32>
    %206 = arith.mulf %204, %205 : vector<2x50xf32>
    %207 = vector.broadcast %1 : vector<1x50xf32> to vector<2x50xf32>
    %208 = arith.addf %206, %207 : vector<2x50xf32>
    %cst_41 = arith.constant 0.000000e+00 : f32
    %209 = vector.broadcast %cst_41 : f32 to vector<2x50xf32>
    %210 = arith.maximumf %208, %209 : vector<2x50xf32>
    %211 = vector.broadcast %2 : vector<1x50xf32> to vector<2x50xf32>
    %212 = arith.mulf %211, %210 : vector<2x50xf32>
    %cst_42 = arith.constant dense<0.000000e+00> : vector<2xf32>
    %213 = vector.multi_reduction <add>, %212, %cst_42 [1] : vector<2x50xf32> to vector<2xf32>
    %214 = vector.shape_cast %213 : vector<2xf32> to vector<2x1xf32>
    %215 = vector.broadcast %3 : vector<1x1xf32> to vector<2x1xf32>
    %216 = arith.addf %214, %215 : vector<2x1xf32>
    %cst_43 = arith.constant 2.000000e+00 : f32
    %217 = vector.broadcast %cst_43 : f32 to vector<2x1xf32>
    %218 = arith.mulf %217, %184 : vector<2x1xf32>
    %219 = arith.addf %168, %218 : vector<2x1xf32>
    %cst_44 = arith.constant 2.000000e+00 : f32
    %220 = vector.broadcast %cst_44 : f32 to vector<2x1xf32>
    %221 = arith.mulf %220, %200 : vector<2x1xf32>
    %222 = arith.addf %219, %221 : vector<2x1xf32>
    %223 = arith.addf %222, %216 : vector<2x1xf32>
    %224 = vector.broadcast %155 : f32 to vector<2x1xf32>
    %225 = arith.mulf %224, %223 : vector<2x1xf32>
    %226 = arith.addf %152, %225 : vector<2x1xf32>
    %c3 = arith.constant 3 : index
    %227 = memref.load %arg0[%c3] : memref<7xf32, #tpu.memory_space<smem>>
    %c3_45 = arith.constant 3 : index
    %228 = memref.load %arg1[%c3_45] : memref<7xf32, #tpu.memory_space<smem>>
    %c3_46 = arith.constant 3 : index
    %229 = memref.load %arg2[%c3_46] : memref<7xf32, #tpu.memory_space<smem>>
    %230 = vector.broadcast %226 : vector<2x1xf32> to vector<2x50xf32>
    %231 = vector.broadcast %0 : vector<1x50xf32> to vector<2x50xf32>
    %232 = arith.mulf %230, %231 : vector<2x50xf32>
    %233 = vector.broadcast %1 : vector<1x50xf32> to vector<2x50xf32>
    %234 = arith.addf %232, %233 : vector<2x50xf32>
    %cst_47 = arith.constant 0.000000e+00 : f32
    %235 = vector.broadcast %cst_47 : f32 to vector<2x50xf32>
    %236 = arith.maximumf %234, %235 : vector<2x50xf32>
    %237 = vector.broadcast %2 : vector<1x50xf32> to vector<2x50xf32>
    %238 = arith.mulf %237, %236 : vector<2x50xf32>
    %cst_48 = arith.constant dense<0.000000e+00> : vector<2xf32>
    %239 = vector.multi_reduction <add>, %238, %cst_48 [1] : vector<2x50xf32> to vector<2xf32>
    %240 = vector.shape_cast %239 : vector<2xf32> to vector<2x1xf32>
    %241 = vector.broadcast %3 : vector<1x1xf32> to vector<2x1xf32>
    %242 = arith.addf %240, %241 : vector<2x1xf32>
    %243 = vector.broadcast %228 : f32 to vector<2x1xf32>
    %244 = arith.mulf %243, %242 : vector<2x1xf32>
    %245 = arith.addf %226, %244 : vector<2x1xf32>
    %246 = vector.broadcast %245 : vector<2x1xf32> to vector<2x50xf32>
    %247 = vector.broadcast %0 : vector<1x50xf32> to vector<2x50xf32>
    %248 = arith.mulf %246, %247 : vector<2x50xf32>
    %249 = vector.broadcast %1 : vector<1x50xf32> to vector<2x50xf32>
    %250 = arith.addf %248, %249 : vector<2x50xf32>
    %cst_49 = arith.constant 0.000000e+00 : f32
    %251 = vector.broadcast %cst_49 : f32 to vector<2x50xf32>
    %252 = arith.maximumf %250, %251 : vector<2x50xf32>
    %253 = vector.broadcast %2 : vector<1x50xf32> to vector<2x50xf32>
    %254 = arith.mulf %253, %252 : vector<2x50xf32>
    %cst_50 = arith.constant dense<0.000000e+00> : vector<2xf32>
    %255 = vector.multi_reduction <add>, %254, %cst_50 [1] : vector<2x50xf32> to vector<2xf32>
    %256 = vector.shape_cast %255 : vector<2xf32> to vector<2x1xf32>
    %257 = vector.broadcast %3 : vector<1x1xf32> to vector<2x1xf32>
    %258 = arith.addf %256, %257 : vector<2x1xf32>
    %259 = vector.broadcast %228 : f32 to vector<2x1xf32>
    %260 = arith.mulf %259, %258 : vector<2x1xf32>
    %261 = arith.addf %226, %260 : vector<2x1xf32>
    %262 = vector.broadcast %261 : vector<2x1xf32> to vector<2x50xf32>
    %263 = vector.broadcast %0 : vector<1x50xf32> to vector<2x50xf32>
    %264 = arith.mulf %262, %263 : vector<2x50xf32>
    %265 = vector.broadcast %1 : vector<1x50xf32> to vector<2x50xf32>
    %266 = arith.addf %264, %265 : vector<2x50xf32>
    %cst_51 = arith.constant 0.000000e+00 : f32
    %267 = vector.broadcast %cst_51 : f32 to vector<2x50xf32>
    %268 = arith.maximumf %266, %267 : vector<2x50xf32>
    %269 = vector.broadcast %2 : vector<1x50xf32> to vector<2x50xf32>
    %270 = arith.mulf %269, %268 : vector<2x50xf32>
    %cst_52 = arith.constant dense<0.000000e+00> : vector<2xf32>
    %271 = vector.multi_reduction <add>, %270, %cst_52 [1] : vector<2x50xf32> to vector<2xf32>
    %272 = vector.shape_cast %271 : vector<2xf32> to vector<2x1xf32>
    %273 = vector.broadcast %3 : vector<1x1xf32> to vector<2x1xf32>
    %274 = arith.addf %272, %273 : vector<2x1xf32>
    %275 = vector.broadcast %227 : f32 to vector<2x1xf32>
    %276 = arith.mulf %275, %274 : vector<2x1xf32>
    %277 = arith.addf %226, %276 : vector<2x1xf32>
    %278 = vector.broadcast %277 : vector<2x1xf32> to vector<2x50xf32>
    %279 = vector.broadcast %0 : vector<1x50xf32> to vector<2x50xf32>
    %280 = arith.mulf %278, %279 : vector<2x50xf32>
    %281 = vector.broadcast %1 : vector<1x50xf32> to vector<2x50xf32>
    %282 = arith.addf %280, %281 : vector<2x50xf32>
    %cst_53 = arith.constant 0.000000e+00 : f32
    %283 = vector.broadcast %cst_53 : f32 to vector<2x50xf32>
    %284 = arith.maximumf %282, %283 : vector<2x50xf32>
    %285 = vector.broadcast %2 : vector<1x50xf32> to vector<2x50xf32>
    %286 = arith.mulf %285, %284 : vector<2x50xf32>
    %cst_54 = arith.constant dense<0.000000e+00> : vector<2xf32>
    %287 = vector.multi_reduction <add>, %286, %cst_54 [1] : vector<2x50xf32> to vector<2xf32>
    %288 = vector.shape_cast %287 : vector<2xf32> to vector<2x1xf32>
    %289 = vector.broadcast %3 : vector<1x1xf32> to vector<2x1xf32>
    %290 = arith.addf %288, %289 : vector<2x1xf32>
    %cst_55 = arith.constant 2.000000e+00 : f32
    %291 = vector.broadcast %cst_55 : f32 to vector<2x1xf32>
    %292 = arith.mulf %291, %258 : vector<2x1xf32>
    %293 = arith.addf %242, %292 : vector<2x1xf32>
    %cst_56 = arith.constant 2.000000e+00 : f32
    %294 = vector.broadcast %cst_56 : f32 to vector<2x1xf32>
    %295 = arith.mulf %294, %274 : vector<2x1xf32>
    %296 = arith.addf %293, %295 : vector<2x1xf32>
    %297 = arith.addf %296, %290 : vector<2x1xf32>
    %298 = vector.broadcast %229 : f32 to vector<2x1xf32>
    %299 = arith.mulf %298, %297 : vector<2x1xf32>
    %300 = arith.addf %226, %299 : vector<2x1xf32>
    %c4 = arith.constant 4 : index
    %301 = memref.load %arg0[%c4] : memref<7xf32, #tpu.memory_space<smem>>
    %c4_57 = arith.constant 4 : index
    %302 = memref.load %arg1[%c4_57] : memref<7xf32, #tpu.memory_space<smem>>
    %c4_58 = arith.constant 4 : index
    %303 = memref.load %arg2[%c4_58] : memref<7xf32, #tpu.memory_space<smem>>
    %304 = vector.broadcast %300 : vector<2x1xf32> to vector<2x50xf32>
    %305 = vector.broadcast %0 : vector<1x50xf32> to vector<2x50xf32>
    %306 = arith.mulf %304, %305 : vector<2x50xf32>
    %307 = vector.broadcast %1 : vector<1x50xf32> to vector<2x50xf32>
    %308 = arith.addf %306, %307 : vector<2x50xf32>
    %cst_59 = arith.constant 0.000000e+00 : f32
    %309 = vector.broadcast %cst_59 : f32 to vector<2x50xf32>
    %310 = arith.maximumf %308, %309 : vector<2x50xf32>
    %311 = vector.broadcast %2 : vector<1x50xf32> to vector<2x50xf32>
    %312 = arith.mulf %311, %310 : vector<2x50xf32>
    %cst_60 = arith.constant dense<0.000000e+00> : vector<2xf32>
    %313 = vector.multi_reduction <add>, %312, %cst_60 [1] : vector<2x50xf32> to vector<2xf32>
    %314 = vector.shape_cast %313 : vector<2xf32> to vector<2x1xf32>
    %315 = vector.broadcast %3 : vector<1x1xf32> to vector<2x1xf32>
    %316 = arith.addf %314, %315 : vector<2x1xf32>
    %317 = vector.broadcast %302 : f32 to vector<2x1xf32>
    %318 = arith.mulf %317, %316 : vector<2x1xf32>
    %319 = arith.addf %300, %318 : vector<2x1xf32>
    %320 = vector.broadcast %319 : vector<2x1xf32> to vector<2x50xf32>
    %321 = vector.broadcast %0 : vector<1x50xf32> to vector<2x50xf32>
    %322 = arith.mulf %320, %321 : vector<2x50xf32>
    %323 = vector.broadcast %1 : vector<1x50xf32> to vector<2x50xf32>
    %324 = arith.addf %322, %323 : vector<2x50xf32>
    %cst_61 = arith.constant 0.000000e+00 : f32
    %325 = vector.broadcast %cst_61 : f32 to vector<2x50xf32>
    %326 = arith.maximumf %324, %325 : vector<2x50xf32>
    %327 = vector.broadcast %2 : vector<1x50xf32> to vector<2x50xf32>
    %328 = arith.mulf %327, %326 : vector<2x50xf32>
    %cst_62 = arith.constant dense<0.000000e+00> : vector<2xf32>
    %329 = vector.multi_reduction <add>, %328, %cst_62 [1] : vector<2x50xf32> to vector<2xf32>
    %330 = vector.shape_cast %329 : vector<2xf32> to vector<2x1xf32>
    %331 = vector.broadcast %3 : vector<1x1xf32> to vector<2x1xf32>
    %332 = arith.addf %330, %331 : vector<2x1xf32>
    %333 = vector.broadcast %302 : f32 to vector<2x1xf32>
    %334 = arith.mulf %333, %332 : vector<2x1xf32>
    %335 = arith.addf %300, %334 : vector<2x1xf32>
    %336 = vector.broadcast %335 : vector<2x1xf32> to vector<2x50xf32>
    %337 = vector.broadcast %0 : vector<1x50xf32> to vector<2x50xf32>
    %338 = arith.mulf %336, %337 : vector<2x50xf32>
    %339 = vector.broadcast %1 : vector<1x50xf32> to vector<2x50xf32>
    %340 = arith.addf %338, %339 : vector<2x50xf32>
    %cst_63 = arith.constant 0.000000e+00 : f32
    %341 = vector.broadcast %cst_63 : f32 to vector<2x50xf32>
    %342 = arith.maximumf %340, %341 : vector<2x50xf32>
    %343 = vector.broadcast %2 : vector<1x50xf32> to vector<2x50xf32>
    %344 = arith.mulf %343, %342 : vector<2x50xf32>
    %cst_64 = arith.constant dense<0.000000e+00> : vector<2xf32>
    %345 = vector.multi_reduction <add>, %344, %cst_64 [1] : vector<2x50xf32> to vector<2xf32>
    %346 = vector.shape_cast %345 : vector<2xf32> to vector<2x1xf32>
    %347 = vector.broadcast %3 : vector<1x1xf32> to vector<2x1xf32>
    %348 = arith.addf %346, %347 : vector<2x1xf32>
    %349 = vector.broadcast %301 : f32 to vector<2x1xf32>
    %350 = arith.mulf %349, %348 : vector<2x1xf32>
    %351 = arith.addf %300, %350 : vector<2x1xf32>
    %352 = vector.broadcast %351 : vector<2x1xf32> to vector<2x50xf32>
    %353 = vector.broadcast %0 : vector<1x50xf32> to vector<2x50xf32>
    %354 = arith.mulf %352, %353 : vector<2x50xf32>
    %355 = vector.broadcast %1 : vector<1x50xf32> to vector<2x50xf32>
    %356 = arith.addf %354, %355 : vector<2x50xf32>
    %cst_65 = arith.constant 0.000000e+00 : f32
    %357 = vector.broadcast %cst_65 : f32 to vector<2x50xf32>
    %358 = arith.maximumf %356, %357 : vector<2x50xf32>
    %359 = vector.broadcast %2 : vector<1x50xf32> to vector<2x50xf32>
    %360 = arith.mulf %359, %358 : vector<2x50xf32>
    %cst_66 = arith.constant dense<0.000000e+00> : vector<2xf32>
    %361 = vector.multi_reduction <add>, %360, %cst_66 [1] : vector<2x50xf32> to vector<2xf32>
    %362 = vector.shape_cast %361 : vector<2xf32> to vector<2x1xf32>
    %363 = vector.broadcast %3 : vector<1x1xf32> to vector<2x1xf32>
    %364 = arith.addf %362, %363 : vector<2x1xf32>
    %cst_67 = arith.constant 2.000000e+00 : f32
    %365 = vector.broadcast %cst_67 : f32 to vector<2x1xf32>
    %366 = arith.mulf %365, %332 : vector<2x1xf32>
    %367 = arith.addf %316, %366 : vector<2x1xf32>
    %cst_68 = arith.constant 2.000000e+00 : f32
    %368 = vector.broadcast %cst_68 : f32 to vector<2x1xf32>
    %369 = arith.mulf %368, %348 : vector<2x1xf32>
    %370 = arith.addf %367, %369 : vector<2x1xf32>
    %371 = arith.addf %370, %364 : vector<2x1xf32>
    %372 = vector.broadcast %303 : f32 to vector<2x1xf32>
    %373 = arith.mulf %372, %371 : vector<2x1xf32>
    %374 = arith.addf %300, %373 : vector<2x1xf32>
    %c5 = arith.constant 5 : index
    %375 = memref.load %arg0[%c5] : memref<7xf32, #tpu.memory_space<smem>>
    %c5_69 = arith.constant 5 : index
    %376 = memref.load %arg1[%c5_69] : memref<7xf32, #tpu.memory_space<smem>>
    %c5_70 = arith.constant 5 : index
    %377 = memref.load %arg2[%c5_70] : memref<7xf32, #tpu.memory_space<smem>>
    %378 = vector.broadcast %374 : vector<2x1xf32> to vector<2x50xf32>
    %379 = vector.broadcast %0 : vector<1x50xf32> to vector<2x50xf32>
    %380 = arith.mulf %378, %379 : vector<2x50xf32>
    %381 = vector.broadcast %1 : vector<1x50xf32> to vector<2x50xf32>
    %382 = arith.addf %380, %381 : vector<2x50xf32>
    %cst_71 = arith.constant 0.000000e+00 : f32
    %383 = vector.broadcast %cst_71 : f32 to vector<2x50xf32>
    %384 = arith.maximumf %382, %383 : vector<2x50xf32>
    %385 = vector.broadcast %2 : vector<1x50xf32> to vector<2x50xf32>
    %386 = arith.mulf %385, %384 : vector<2x50xf32>
    %cst_72 = arith.constant dense<0.000000e+00> : vector<2xf32>
    %387 = vector.multi_reduction <add>, %386, %cst_72 [1] : vector<2x50xf32> to vector<2xf32>
    %388 = vector.shape_cast %387 : vector<2xf32> to vector<2x1xf32>
    %389 = vector.broadcast %3 : vector<1x1xf32> to vector<2x1xf32>
    %390 = arith.addf %388, %389 : vector<2x1xf32>
    %391 = vector.broadcast %376 : f32 to vector<2x1xf32>
    %392 = arith.mulf %391, %390 : vector<2x1xf32>
    %393 = arith.addf %374, %392 : vector<2x1xf32>
    %394 = vector.broadcast %393 : vector<2x1xf32> to vector<2x50xf32>
    %395 = vector.broadcast %0 : vector<1x50xf32> to vector<2x50xf32>
    %396 = arith.mulf %394, %395 : vector<2x50xf32>
    %397 = vector.broadcast %1 : vector<1x50xf32> to vector<2x50xf32>
    %398 = arith.addf %396, %397 : vector<2x50xf32>
    %cst_73 = arith.constant 0.000000e+00 : f32
    %399 = vector.broadcast %cst_73 : f32 to vector<2x50xf32>
    %400 = arith.maximumf %398, %399 : vector<2x50xf32>
    %401 = vector.broadcast %2 : vector<1x50xf32> to vector<2x50xf32>
    %402 = arith.mulf %401, %400 : vector<2x50xf32>
    %cst_74 = arith.constant dense<0.000000e+00> : vector<2xf32>
    %403 = vector.multi_reduction <add>, %402, %cst_74 [1] : vector<2x50xf32> to vector<2xf32>
    %404 = vector.shape_cast %403 : vector<2xf32> to vector<2x1xf32>
    %405 = vector.broadcast %3 : vector<1x1xf32> to vector<2x1xf32>
    %406 = arith.addf %404, %405 : vector<2x1xf32>
    %407 = vector.broadcast %376 : f32 to vector<2x1xf32>
    %408 = arith.mulf %407, %406 : vector<2x1xf32>
    %409 = arith.addf %374, %408 : vector<2x1xf32>
    %410 = vector.broadcast %409 : vector<2x1xf32> to vector<2x50xf32>
    %411 = vector.broadcast %0 : vector<1x50xf32> to vector<2x50xf32>
    %412 = arith.mulf %410, %411 : vector<2x50xf32>
    %413 = vector.broadcast %1 : vector<1x50xf32> to vector<2x50xf32>
    %414 = arith.addf %412, %413 : vector<2x50xf32>
    %cst_75 = arith.constant 0.000000e+00 : f32
    %415 = vector.broadcast %cst_75 : f32 to vector<2x50xf32>
    %416 = arith.maximumf %414, %415 : vector<2x50xf32>
    %417 = vector.broadcast %2 : vector<1x50xf32> to vector<2x50xf32>
    %418 = arith.mulf %417, %416 : vector<2x50xf32>
    %cst_76 = arith.constant dense<0.000000e+00> : vector<2xf32>
    %419 = vector.multi_reduction <add>, %418, %cst_76 [1] : vector<2x50xf32> to vector<2xf32>
    %420 = vector.shape_cast %419 : vector<2xf32> to vector<2x1xf32>
    %421 = vector.broadcast %3 : vector<1x1xf32> to vector<2x1xf32>
    %422 = arith.addf %420, %421 : vector<2x1xf32>
    %423 = vector.broadcast %375 : f32 to vector<2x1xf32>
    %424 = arith.mulf %423, %422 : vector<2x1xf32>
    %425 = arith.addf %374, %424 : vector<2x1xf32>
    %426 = vector.broadcast %425 : vector<2x1xf32> to vector<2x50xf32>
    %427 = vector.broadcast %0 : vector<1x50xf32> to vector<2x50xf32>
    %428 = arith.mulf %426, %427 : vector<2x50xf32>
    %429 = vector.broadcast %1 : vector<1x50xf32> to vector<2x50xf32>
    %430 = arith.addf %428, %429 : vector<2x50xf32>
    %cst_77 = arith.constant 0.000000e+00 : f32
    %431 = vector.broadcast %cst_77 : f32 to vector<2x50xf32>
    %432 = arith.maximumf %430, %431 : vector<2x50xf32>
    %433 = vector.broadcast %2 : vector<1x50xf32> to vector<2x50xf32>
    %434 = arith.mulf %433, %432 : vector<2x50xf32>
    %cst_78 = arith.constant dense<0.000000e+00> : vector<2xf32>
    %435 = vector.multi_reduction <add>, %434, %cst_78 [1] : vector<2x50xf32> to vector<2xf32>
    %436 = vector.shape_cast %435 : vector<2xf32> to vector<2x1xf32>
    %437 = vector.broadcast %3 : vector<1x1xf32> to vector<2x1xf32>
    %438 = arith.addf %436, %437 : vector<2x1xf32>
    %cst_79 = arith.constant 2.000000e+00 : f32
    %439 = vector.broadcast %cst_79 : f32 to vector<2x1xf32>
    %440 = arith.mulf %439, %406 : vector<2x1xf32>
    %441 = arith.addf %390, %440 : vector<2x1xf32>
    %cst_80 = arith.constant 2.000000e+00 : f32
    %442 = vector.broadcast %cst_80 : f32 to vector<2x1xf32>
    %443 = arith.mulf %442, %422 : vector<2x1xf32>
    %444 = arith.addf %441, %443 : vector<2x1xf32>
    %445 = arith.addf %444, %438 : vector<2x1xf32>
    %446 = vector.broadcast %377 : f32 to vector<2x1xf32>
    %447 = arith.mulf %446, %445 : vector<2x1xf32>
    %448 = arith.addf %374, %447 : vector<2x1xf32>
    %c6 = arith.constant 6 : index
    %449 = memref.load %arg0[%c6] : memref<7xf32, #tpu.memory_space<smem>>
    %c6_81 = arith.constant 6 : index
    %450 = memref.load %arg1[%c6_81] : memref<7xf32, #tpu.memory_space<smem>>
    %c6_82 = arith.constant 6 : index
    %451 = memref.load %arg2[%c6_82] : memref<7xf32, #tpu.memory_space<smem>>
    %452 = vector.broadcast %448 : vector<2x1xf32> to vector<2x50xf32>
    %453 = vector.broadcast %0 : vector<1x50xf32> to vector<2x50xf32>
    %454 = arith.mulf %452, %453 : vector<2x50xf32>
    %455 = vector.broadcast %1 : vector<1x50xf32> to vector<2x50xf32>
    %456 = arith.addf %454, %455 : vector<2x50xf32>
    %cst_83 = arith.constant 0.000000e+00 : f32
    %457 = vector.broadcast %cst_83 : f32 to vector<2x50xf32>
    %458 = arith.maximumf %456, %457 : vector<2x50xf32>
    %459 = vector.broadcast %2 : vector<1x50xf32> to vector<2x50xf32>
    %460 = arith.mulf %459, %458 : vector<2x50xf32>
    %cst_84 = arith.constant dense<0.000000e+00> : vector<2xf32>
    %461 = vector.multi_reduction <add>, %460, %cst_84 [1] : vector<2x50xf32> to vector<2xf32>
    %462 = vector.shape_cast %461 : vector<2xf32> to vector<2x1xf32>
    %463 = vector.broadcast %3 : vector<1x1xf32> to vector<2x1xf32>
    %464 = arith.addf %462, %463 : vector<2x1xf32>
    %465 = vector.broadcast %450 : f32 to vector<2x1xf32>
    %466 = arith.mulf %465, %464 : vector<2x1xf32>
    %467 = arith.addf %448, %466 : vector<2x1xf32>
    %468 = vector.broadcast %467 : vector<2x1xf32> to vector<2x50xf32>
    %469 = vector.broadcast %0 : vector<1x50xf32> to vector<2x50xf32>
    %470 = arith.mulf %468, %469 : vector<2x50xf32>
    %471 = vector.broadcast %1 : vector<1x50xf32> to vector<2x50xf32>
    %472 = arith.addf %470, %471 : vector<2x50xf32>
    %cst_85 = arith.constant 0.000000e+00 : f32
    %473 = vector.broadcast %cst_85 : f32 to vector<2x50xf32>
    %474 = arith.maximumf %472, %473 : vector<2x50xf32>
    %475 = vector.broadcast %2 : vector<1x50xf32> to vector<2x50xf32>
    %476 = arith.mulf %475, %474 : vector<2x50xf32>
    %cst_86 = arith.constant dense<0.000000e+00> : vector<2xf32>
    %477 = vector.multi_reduction <add>, %476, %cst_86 [1] : vector<2x50xf32> to vector<2xf32>
    %478 = vector.shape_cast %477 : vector<2xf32> to vector<2x1xf32>
    %479 = vector.broadcast %3 : vector<1x1xf32> to vector<2x1xf32>
    %480 = arith.addf %478, %479 : vector<2x1xf32>
    %481 = vector.broadcast %450 : f32 to vector<2x1xf32>
    %482 = arith.mulf %481, %480 : vector<2x1xf32>
    %483 = arith.addf %448, %482 : vector<2x1xf32>
    %484 = vector.broadcast %483 : vector<2x1xf32> to vector<2x50xf32>
    %485 = vector.broadcast %0 : vector<1x50xf32> to vector<2x50xf32>
    %486 = arith.mulf %484, %485 : vector<2x50xf32>
    %487 = vector.broadcast %1 : vector<1x50xf32> to vector<2x50xf32>
    %488 = arith.addf %486, %487 : vector<2x50xf32>
    %cst_87 = arith.constant 0.000000e+00 : f32
    %489 = vector.broadcast %cst_87 : f32 to vector<2x50xf32>
    %490 = arith.maximumf %488, %489 : vector<2x50xf32>
    %491 = vector.broadcast %2 : vector<1x50xf32> to vector<2x50xf32>
    %492 = arith.mulf %491, %490 : vector<2x50xf32>
    %cst_88 = arith.constant dense<0.000000e+00> : vector<2xf32>
    %493 = vector.multi_reduction <add>, %492, %cst_88 [1] : vector<2x50xf32> to vector<2xf32>
    %494 = vector.shape_cast %493 : vector<2xf32> to vector<2x1xf32>
    %495 = vector.broadcast %3 : vector<1x1xf32> to vector<2x1xf32>
    %496 = arith.addf %494, %495 : vector<2x1xf32>
    %497 = vector.broadcast %449 : f32 to vector<2x1xf32>
    %498 = arith.mulf %497, %496 : vector<2x1xf32>
    %499 = arith.addf %448, %498 : vector<2x1xf32>
    %500 = vector.broadcast %499 : vector<2x1xf32> to vector<2x50xf32>
    %501 = vector.broadcast %0 : vector<1x50xf32> to vector<2x50xf32>
    %502 = arith.mulf %500, %501 : vector<2x50xf32>
    %503 = vector.broadcast %1 : vector<1x50xf32> to vector<2x50xf32>
    %504 = arith.addf %502, %503 : vector<2x50xf32>
    %cst_89 = arith.constant 0.000000e+00 : f32
    %505 = vector.broadcast %cst_89 : f32 to vector<2x50xf32>
    %506 = arith.maximumf %504, %505 : vector<2x50xf32>
    %507 = vector.broadcast %2 : vector<1x50xf32> to vector<2x50xf32>
    %508 = arith.mulf %507, %506 : vector<2x50xf32>
    %cst_90 = arith.constant dense<0.000000e+00> : vector<2xf32>
    %509 = vector.multi_reduction <add>, %508, %cst_90 [1] : vector<2x50xf32> to vector<2xf32>
    %510 = vector.shape_cast %509 : vector<2xf32> to vector<2x1xf32>
    %511 = vector.broadcast %3 : vector<1x1xf32> to vector<2x1xf32>
    %512 = arith.addf %510, %511 : vector<2x1xf32>
    %cst_91 = arith.constant 2.000000e+00 : f32
    %513 = vector.broadcast %cst_91 : f32 to vector<2x1xf32>
    %514 = arith.mulf %513, %480 : vector<2x1xf32>
    %515 = arith.addf %464, %514 : vector<2x1xf32>
    %cst_92 = arith.constant 2.000000e+00 : f32
    %516 = vector.broadcast %cst_92 : f32 to vector<2x1xf32>
    %517 = arith.mulf %516, %496 : vector<2x1xf32>
    %518 = arith.addf %515, %517 : vector<2x1xf32>
    %519 = arith.addf %518, %512 : vector<2x1xf32>
    %520 = vector.broadcast %451 : f32 to vector<2x1xf32>
    %521 = arith.mulf %520, %519 : vector<2x1xf32>
    %522 = arith.addf %448, %521 : vector<2x1xf32>
    %523 = tpu.concatenate %4, %78, %152, %226, %300, %374, %448, %522 in 1 : vector<2x1xf32>, vector<2x1xf32>, vector<2x1xf32>, vector<2x1xf32>, vector<2x1xf32>, vector<2x1xf32>, vector<2x1xf32>, vector<2x1xf32> -> vector<2x8xf32>
    %c0_93 = arith.constant 0 : index
    %c0_94 = arith.constant 0 : index
    %524 = vector.load %arg8[%c0_93, %c0_94] : memref<2x8xf32, #tpu.memory_space<vmem>>, vector<2x8xf32>
    tpu.vector_store %arg8[%c0_93, %c0_94], %523 {strides = array<i32>} : memref<2x8xf32, #tpu.memory_space<vmem>>, vector<2x8xf32>,
    return
  }
}

</mosaic_0001>

<bundles_post_ra>
// kernel: tpu_custom_call.1
= control target key start
LH: loop header
LB: loop body
LE: loop exit
PB: predicated region body
PF: predicated region fallthrough
CT: control target
= control target key end

     0   :  { %s1035_s0 = inlined_call_operand.vmem [shape: f32[7], index: 0, kind: input, shape index: {}]   ;;  %s1036_s1 = inlined_call_operand.vmem [shape: f32[7], index: 1, kind: input, shape index: {}]   ;;  %s1037_s2 = inlined_call_operand.vmem [shape: f32[7], index: 2, kind: input, shape index: {}]   ;;  %s1038_s3 = inlined_call_operand.vmem [shape: f32[2,1], index: 3, kind: input, shape index: {}]   ;;  %s1039_s4 = inlined_call_operand.vmem [shape: f32[1,50], index: 4, kind: input, shape index: {}]   ;;  %s1040_s5 = inlined_call_operand.vmem [shape: f32[1,50], index: 5, kind: input, shape index: {}]   ;;  %s1041_s6 = inlined_call_operand.vmem [shape: f32[1,50], index: 6, kind: input, shape index: {}]   ;;  %s1042_s7 = inlined_call_operand.<no memory space> [shape: f32[1,1], index: 7, kind: input, shape index: {}]   ;;  %s1043_s8 = inlined_call_operand.hbm [shape: f32[2,8], index: 8, kind: output, shape index: {}]  }
   0x1   :  { %v13_v0 = vstv %s1042_s7 }
   0x2   :  { %14 = vst [vmem:[#allocation2] sm:$0x1] %v13_v0 }
   0x3   :  { %15 = vsyncpa [#allocation5], 0 }
   0x4   :  { %16 = vsyncpa [#allocation7], 0  ;;  %s34_s9 = sshll.u32 %s1036_s1, 4  ;;  %s35_s9 = int_to_ptr.vmem [resolvable:$true] %s34_s9 }
   0x5   :  { %17 = vsyncpa [#allocation4], 0  ;;  %s24_s12 = sshll.u32 %s1035_s0, 4  ;;  %s685_s13 = scalar_lea.vmem %s35_s9, 16  ;;  %s25_s12 = int_to_ptr.vmem [resolvable:$true] %s24_s12 }
   0x6   :  { %p686_p0 = scmp.ne.s32.totalorder %s35_s9, %s685_s13  ;;  %p690_p1 = scmp.lt.s32.totalorder %s35_s9, %s35_s9 }
   0x7   :  { %p691_p2 = scmp.lt.s32.totalorder %s685_s13, %s685_s13 }
   0x9   :  { %p692_p3 = por %p691_p2, %p690_p1 }
   0xb   :  { %p693_p4 = pnand %p692_p3, %p686_p0 }
   0xd   :  { %696 = shalt.err (!%p693_p4)
}
   0xe   :  { %s747_s7 = smov [#allocation6]   ;;  %s697_s14 = scalar_lea.vmem %s25_s12, 16 }
   0xf   :  { %37 = dma.vmem_to_smem %s35_s9, 16, %s747_s7, [#allocation7]  }
  0x10   :  { %p698_p5 = scmp.ne.s32.totalorder %s25_s12, %s697_s14  ;;  %p702_p6 = scmp.lt.s32.totalorder %s25_s12, %s25_s12 }
  0x11   :  { %p703_p7 = scmp.lt.s32.totalorder %s697_s14, %s697_s14 }
  0x13   :  { %p704_p8 = por %p703_p7, %p702_p6 }
  0x15   :  { %p705_p9 = pnand %p704_p8, %p698_p5 }
  0x17   :  { %708 = shalt.err (!%p705_p9)
}
  0x18   :  { %s748_s1 = smov [#allocation3]   ;;  %s44_s16 = sshll.u32 %s1037_s2, 4  ;;  %s45_s16 = int_to_ptr.vmem [resolvable:$true] %s44_s16 }
  0x19   :  { %27 = dma.vmem_to_smem %s25_s12, 16, %s748_s1, [#allocation5]  }
  0x1a   :  { %s709_s17 = scalar_lea.vmem %s45_s16, 16  ;;  %p714_p11 = scmp.lt.s32.totalorder %s45_s16, %s45_s16 }
  0x1b   :  { %p710_p10 = scmp.ne.s32.totalorder %s45_s16, %s709_s17  ;;  %p715_p12 = scmp.lt.s32.totalorder %s709_s17, %s709_s17 }
  0x1d   :  { %p716_p13 = por %p715_p12, %p714_p11 }
  0x1f   :  { %p717_p0 = pnand %p716_p13, %p710_p10 }
  0x21   :  { %720 = shalt.err (!%p717_p0)
}
  0x22   :  { %s749_s18 = smov [#allocation8]  }
  0x23   :  { %47 = dma.vmem_to_smem %s45_s16, 16, %s749_s18, [#allocation7]  }
  0x24   :  { %741 = dma.done.wait [#allocation5], 16  }
  0x25   :  { %742 = vsyncadd [#allocation5], 4294967280 }
  0x26   :  { %743 = dma.done.wait [#allocation7], 32  }
  0x27   :  { %744 = vsyncadd [#allocation7], 4294967264 }
  0x28   :  { %67 = sfence }
  0x29   :  { %v819_v1 = vld [vmem:[%s1038_s3] sm:$0x3]  ;;  %v750_v2 = vmov 0   ;;  %vm103_vm0 = vcmask 402432   ;;  %s654_s25 = sld [smem:[#allocation6 + $0x1]]  ;;  %s751_s17 = smov 1  }
  0x2a   :  { %683 = vset.pattern.permute.xlu0 %v750_v2  ;;  %684 = vset.pattern.permute.xlu1 %v750_v2  ;;  %v825_v3 = vld [vmem:[%s1039_s4] ss:$0 sm:$0xff]  ;;  %s74_s4 = sld [smem:[#allocation6]]  ;;  %s752_s18 = smov 3   ;;  %vm617_vm1 = vcmask 7168   ;;  %vm619_vm2 = vcmask 15360  }
  0x2b   :  { %78 = vperm.xlu0 %683, %v819_v1   ;;  %v830_v5 = vld [vmem:[%s1040_s5] ss:$0 sm:$0xff]  ;;  %s73_s5 = sld [smem:[#allocation3]]  ;;  %s753_s19 = smov 4   ;;  %vm621_vm3 = vcmask 23552   ;;  %vm623_vm4 = vcmask 31744  }
  0x2c   :  { %v837_v8 = vld [vmem:[%s1041_s6] ss:$0 sm:$0xff]  ;;  %s75_s6 = sld [smem:[#allocation8]]  ;;  %s754_s20 = smov 5   ;;  %vm625_vm5 = vcmask 39936   ;;  %vm627_vm6 = vcmask 48128  }
  0x2d   :  { %v841_v12 = vld [vmem:[#allocation2] ss:$0 sm:$0xff]  ;;  %s653_s26 = sld [smem:[#allocation3 + $0x1]]  ;;  %s755_s2 = smov 6   ;;  %vm629_vm7 = vcmask 56320   ;;  %vm631_vm8 = vcmask 58368  }
  0x2e   :  { %s655_s27 = sld [smem:[#allocation8 + $0x1]]  ;;  %s756_s21 = smov 2  }
  0x2f   :  { %v185_v61 = vstv %s654_s25  ;;  %s657_s28 = sld [smem:[#allocation6 + $0x2]]  ;;  %s757_s23 = smov 7  }
  0x30   :  { %v114_v13 = vstv %s74_s4  ;;  %s656_s29 = sld [smem:[#allocation3 + $0x2]]  ;;  %s758_s3 = smov [#allocation9]  }
  0x31   :  { %v145_v35 = vstv %s73_s5  ;;  %s658_s30 = sld [smem:[#allocation8 + $0x2]]  ;;  %s639_s24 = sshll.u32 %s758_s3, 4  ;;  %s640_s24 = int_to_ptr.vmem [resolvable:$true] %s639_s24 }
  0x32   :  { %v166_v51 = vstv %s75_s6  ;;  %s660_s9 = sld [smem:[#allocation6 + $0x3]]  ;;  %s721_s4 = scalar_lea.vmem %s640_s24, 32 }
  0x33   :  { %s659_s10 = sld [smem:[#allocation3 + $0x3]]  ;;  %p722_p1 = scmp.ne.s32.totalorder %s640_s24, %s721_s4 }
  0x34   :  { %s661_s11 = sld [smem:[#allocation8 + $0x3]]  ;;  %p726_p2 = scmp.lt.s32.totalorder %s640_s24, %s640_s24 }
  0x35   :  { %s663_s12 = sld [smem:[#allocation6 + $0x4]]  ;;  %p727_p3 = scmp.lt.s32.totalorder %s721_s4, %s721_s4 }
  0x36   :  { %s662_s13 = sld [smem:[#allocation3 + $0x4]] }
  0x37   :  { %s664_s7 = sld [smem:[#allocation8 + $0x4]]  ;;  %p728_p4 = por %p727_p3, %p726_p2 }
  0x38   :  { %s666_s14 = sld [smem:[#allocation6 + $0x5]] }
  0x39   :  { %s665_s1 = sld [smem:[#allocation3 + $0x5]]  ;;  %p729_p5 = pnand %p728_p4, %p722_p1 }
  0x3a   :  { %s667_s0 = sld [smem:[#allocation8 + $0x5]] }
  0x3b   :  { %s669_s15 = sld [smem:[#allocation6 + $0x6]] }
  0x3c   :  { %s668_s16 = sld [smem:[#allocation3 + $0x6]] }
  0x3d   :  { %s670_s22 = sld [smem:[#allocation8 + $0x6]] }
  0xa6   :  { %v79_v4 = vpop.permute.xlu0 %78 }
  0xa7   :  { %v87_v6 = vmul.f32 %v825_v3, %v79_v4 }
  0xa9   :  { %v94_v7 = vadd.f32 %v830_v5, %v87_v6 }
  0xab   :  { %v95_v9 = vmax.f32 %v94_v7, 0.0 }
  0xad   :  { %v102_v10 = vmul.f32 %v837_v8, %v95_v9 }
  0xaf   :  { %v104_v11 = vsel %vm103_vm0, %v102_v10, 0.0 }
  0xb0   :  { %105 = vadd.xlane.f32.xlu0 %v104_v11 }
 0x139   :  { %v106_v14 = vpop.xlane.xlu0 %105 }
 0x13a   :  { %v113_v15 = vadd.f32 %v841_v12, %v106_v14 }
 0x13c   :  { %v115_v16 = vmul.f32 %v114_v13, %v113_v15 }
 0x13e   :  { %v116_v17 = vadd.f32 %v115_v16, %v819_v1 }
 0x140   :  { %119 = vperm.xlu1 %684, %v116_v17  }
 0x1bb   :  { %v120_v18 = vpop.permute.xlu1 %119 }
 0x1bc   :  { %v122_v19 = vmul.f32 %v825_v3, %v120_v18 }
 0x1be   :  { %v123_v20 = vadd.f32 %v830_v5, %v122_v19 }
 0x1c0   :  { %v124_v21 = vmax.f32 %v123_v20, 0.0 }
 0x1c2   :  { %v125_v22 = vmul.f32 %v837_v8, %v124_v21 }
 0x1c4   :  { %v126_v23 = vsel %vm103_vm0, %v125_v22, 0.0 }
 0x1c5   :  { %127 = vadd.xlane.f32.xlu1 %v126_v23 }
 0x24e   :  { %v128_v24 = vpop.xlane.xlu1 %127 }
 0x24f   :  { %v129_v25 = vadd.f32 %v841_v12, %v128_v24  ;;  %v216_v24 = vstv %s653_s26 }
 0x251   :  { %v130_v26 = vmul.f32 %v129_v25, %v114_v13  ;;  %v161_v34 = vmul.f32 2.0, %v129_v25 }
 0x253   :  { %v131_v27 = vadd.f32 %v130_v26, %v819_v1  ;;  %v162_v38 = vadd.f32 %v161_v34, %v113_v15 }
 0x255   :  { %134 = vperm.xlu0 %683, %v131_v27  }
 0x2d0   :  { %v135_v28 = vpop.permute.xlu0 %134 }
 0x2d1   :  { %v137_v29 = vmul.f32 %v825_v3, %v135_v28 }
 0x2d3   :  { %v138_v30 = vadd.f32 %v830_v5, %v137_v29 }
 0x2d5   :  { %v139_v31 = vmax.f32 %v138_v30, 0.0 }
 0x2d7   :  { %v140_v32 = vmul.f32 %v837_v8, %v139_v31 }
 0x2d9   :  { %v141_v33 = vsel %vm103_vm0, %v140_v32, 0.0 }
 0x2da   :  { %142 = vadd.xlane.f32.xlu1 %v141_v33 }
 0x363   :  { %v143_v36 = vpop.xlane.xlu1 %142 }
 0x364   :  { %v144_v37 = vadd.f32 %v841_v12, %v143_v36 }
 0x366   :  { %v146_v39 = vmul.f32 %v145_v35, %v144_v37  ;;  %v163_v40 = vmul.f32 2.0, %v144_v37 }
 0x368   :  { %v147_v41 = vadd.f32 %v146_v39, %v819_v1  ;;  %v164_v42 = vadd.f32 %v163_v40, %v162_v38  ;;  %v237_v40 = vstv %s655_s27 }
 0x36a   :  { %150 = vperm.xlu1 %684, %v147_v41  }
 0x3e5   :  { %v151_v43 = vpop.permute.xlu1 %150 }
 0x3e6   :  { %v153_v44 = vmul.f32 %v825_v3, %v151_v43 }
 0x3e8   :  { %v154_v45 = vadd.f32 %v830_v5, %v153_v44 }
 0x3ea   :  { %v155_v46 = vmax.f32 %v154_v45, 0.0 }
 0x3ec   :  { %v156_v47 = vmul.f32 %v837_v8, %v155_v46 }
 0x3ee   :  { %v157_v48 = vsel %vm103_vm0, %v156_v47, 0.0 }
 0x3ef   :  { %158 = vadd.xlane.f32.xlu0 %v157_v48 }
 0x478   :  { %v159_v49 = vpop.xlane.xlu0 %158 }
 0x479   :  { %v160_v50 = vadd.f32 %v841_v12, %v159_v49 }
 0x47b   :  { %v165_v52 = vadd.f32 %v164_v42, %v160_v50  ;;  %v256_v50 = vstv %s657_s28 }
 0x47d   :  { %v167_v53 = vmul.f32 %v166_v51, %v165_v52 }
 0x47f   :  { %v863_v54 = vadd.f32 %v167_v53, %v819_v1 }
 0x481   :  { %174 = vperm.xlu1 %684, %v863_v54  }
 0x4fc   :  { %v175_v55 = vpop.permute.xlu1 %174 }
 0x4fd   :  { %v177_v56 = vmul.f32 %v825_v3, %v175_v55 }
 0x4ff   :  { %v178_v57 = vadd.f32 %v830_v5, %v177_v56 }
 0x501   :  { %v179_v58 = vmax.f32 %v178_v57, 0.0 }
 0x503   :  { %v180_v59 = vmul.f32 %v837_v8, %v179_v58 }
 0x505   :  { %v181_v60 = vsel %vm103_vm0, %v180_v59, 0.0 }
 0x506   :  { %182 = vadd.xlane.f32.xlu1 %v181_v60 }
 0x58f   :  { %v183_v62 = vpop.xlane.xlu1 %182 }
 0x590   :  { %v184_v63 = vadd.f32 %v841_v12, %v183_v62 }
 0x592   :  { %v186_v0 = vmul.f32 %v185_v61, %v184_v63 }
 0x594   :  { %v187_v2 = vadd.f32 %v186_v0, %v863_v54 }
 0x596   :  { %190 = vperm.xlu0 %683, %v187_v2  }
 0x611   :  { %v191_v4 = vpop.permute.xlu0 %190 }
 0x612   :  { %v193_v6 = vmul.f32 %v825_v3, %v191_v4 }
 0x614   :  { %v194_v7 = vadd.f32 %v830_v5, %v193_v6 }
 0x616   :  { %v195_v9 = vmax.f32 %v194_v7, 0.0 }
 0x618   :  { %v196_v10 = vmul.f32 %v837_v8, %v195_v9 }
 0x61a   :  { %v197_v11 = vsel %vm103_vm0, %v196_v10, 0.0 }
 0x61b   :  { %198 = vadd.xlane.f32.xlu1 %v197_v11 }
 0x6a4   :  { %v199_v13 = vpop.xlane.xlu1 %198 }
 0x6a5   :  { %v200_v14 = vadd.f32 %v841_v12, %v199_v13 }
 0x6a7   :  { %v201_v15 = vmul.f32 %v200_v14, %v185_v61  ;;  %v232_v23 = vmul.f32 2.0, %v200_v14  ;;  %v287_v14 = vstv %s656_s29 }
 0x6a9   :  { %v202_v16 = vadd.f32 %v201_v15, %v863_v54  ;;  %v233_v27 = vadd.f32 %v232_v23, %v184_v63 }
 0x6ab   :  { %205 = vperm.xlu1 %684, %v202_v16  }
 0x726   :  { %v206_v17 = vpop.permute.xlu1 %205 }
 0x727   :  { %v208_v18 = vmul.f32 %v825_v3, %v206_v17 }
 0x729   :  { %v209_v19 = vadd.f32 %v830_v5, %v208_v18 }
 0x72b   :  { %v210_v20 = vmax.f32 %v209_v19, 0.0 }
 0x72d   :  { %v211_v21 = vmul.f32 %v837_v8, %v210_v20 }
 0x72f   :  { %v212_v22 = vsel %vm103_vm0, %v211_v21, 0.0 }
 0x730   :  { %213 = vadd.xlane.f32.xlu0 %v212_v22 }
 0x7b9   :  { %v214_v25 = vpop.xlane.xlu0 %213 }
 0x7ba   :  { %v215_v26 = vadd.f32 %v841_v12, %v214_v25 }
 0x7bc   :  { %v217_v28 = vmul.f32 %v216_v24, %v215_v26  ;;  %v234_v29 = vmul.f32 2.0, %v215_v26 }
 0x7be   :  { %v218_v30 = vadd.f32 %v217_v28, %v863_v54  ;;  %v235_v31 = vadd.f32 %v234_v29, %v233_v27 }
 0x7c0   :  { %221 = vperm.xlu1 %684, %v218_v30   ;;  %v308_v30 = vstv %s658_s30 }
 0x83b   :  { %v222_v32 = vpop.permute.xlu1 %221 }
 0x83c   :  { %v224_v33 = vmul.f32 %v825_v3, %v222_v32 }
 0x83e   :  { %v225_v34 = vadd.f32 %v830_v5, %v224_v33 }
 0x840   :  { %v226_v35 = vmax.f32 %v225_v34, 0.0 }
 0x842   :  { %v227_v36 = vmul.f32 %v837_v8, %v226_v35 }
 0x844   :  { %v228_v37 = vsel %vm103_vm0, %v227_v36, 0.0 }
 0x845   :  { %229 = vadd.xlane.f32.xlu1 %v228_v37 }
 0x8ce   :  { %v230_v38 = vpop.xlane.xlu1 %229 }
 0x8cf   :  { %v231_v39 = vadd.f32 %v841_v12, %v230_v38 }
 0x8d1   :  { %v236_v41 = vadd.f32 %v235_v31, %v231_v39 }
 0x8d3   :  { %v238_v42 = vmul.f32 %v237_v40, %v236_v41  ;;  %v327_v40 = vstv %s660_s9 }
 0x8d5   :  { %v890_v43 = vadd.f32 %v238_v42, %v863_v54 }
 0x8d7   :  { %245 = vperm.xlu0 %683, %v890_v43  }
 0x952   :  { %v246_v44 = vpop.permute.xlu0 %245 }
 0x953   :  { %v248_v45 = vmul.f32 %v825_v3, %v246_v44 }
 0x955   :  { %v249_v46 = vadd.f32 %v830_v5, %v248_v45 }
 0x957   :  { %v250_v47 = vmax.f32 %v249_v46, 0.0 }
 0x959   :  { %v251_v48 = vmul.f32 %v837_v8, %v250_v47 }
 0x95b   :  { %v252_v49 = vsel %vm103_vm0, %v251_v48, 0.0 }
 0x95c   :  { %253 = vadd.xlane.f32.xlu1 %v252_v49 }
 0x9e5   :  { %v254_v51 = vpop.xlane.xlu1 %253 }
 0x9e6   :  { %v255_v52 = vadd.f32 %v841_v12, %v254_v51 }
 0x9e8   :  { %v257_v53 = vmul.f32 %v256_v50, %v255_v52 }
 0x9ea   :  { %v258_v55 = vadd.f32 %v257_v53, %v890_v43 }
 0x9ec   :  { %261 = vperm.xlu0 %683, %v258_v55  }
 0xa67   :  { %v262_v56 = vpop.permute.xlu0 %261 }
 0xa68   :  { %v264_v57 = vmul.f32 %v825_v3, %v262_v56 }
 0xa6a   :  { %v265_v58 = vadd.f32 %v830_v5, %v264_v57 }
 0xa6c   :  { %v266_v59 = vmax.f32 %v265_v58, 0.0 }
 0xa6e   :  { %v267_v60 = vmul.f32 %v837_v8, %v266_v59 }
 0xa70   :  { %v268_v61 = vsel %vm103_vm0, %v267_v60, 0.0 }
 0xa71   :  { %269 = vadd.xlane.f32.xlu1 %v268_v61 }
 0xafa   :  { %v270_v62 = vpop.xlane.xlu1 %269 }
 0xafb   :  { %v271_v63 = vadd.f32 %v841_v12, %v270_v62 }
 0xafd   :  { %v272_v0 = vmul.f32 %v271_v63, %v256_v50  ;;  %v303_v13 = vmul.f32 2.0, %v271_v63 }
 0xaff   :  { %v273_v2 = vadd.f32 %v272_v0, %v890_v43  ;;  %v304_v17 = vadd.f32 %v303_v13, %v255_v52  ;;  %v358_v0 = vstv %s659_s10 }
 0xb01   :  { %276 = vperm.xlu0 %683, %v273_v2  }
 0xb7c   :  { %v277_v4 = vpop.permute.xlu0 %276 }
 0xb7d   :  { %v279_v6 = vmul.f32 %v825_v3, %v277_v4 }
 0xb7f   :  { %v280_v7 = vadd.f32 %v830_v5, %v279_v6 }
 0xb81   :  { %v281_v9 = vmax.f32 %v280_v7, 0.0 }
 0xb83   :  { %v282_v10 = vmul.f32 %v837_v8, %v281_v9 }
 0xb85   :  { %v283_v11 = vsel %vm103_vm0, %v282_v10, 0.0 }
 0xb86   :  { %284 = vadd.xlane.f32.xlu1 %v283_v11 }
 0xc0f   :  { %v285_v15 = vpop.xlane.xlu1 %284 }
 0xc10   :  { %v286_v16 = vadd.f32 %v841_v12, %v285_v15 }
 0xc12   :  { %v288_v18 = vmul.f32 %v287_v14, %v286_v16  ;;  %v305_v19 = vmul.f32 2.0, %v286_v16 }
 0xc14   :  { %v289_v20 = vadd.f32 %v288_v18, %v890_v43  ;;  %v306_v21 = vadd.f32 %v305_v19, %v304_v17 }
 0xc16   :  { %292 = vperm.xlu0 %683, %v289_v20  }
 0xc91   :  { %v293_v22 = vpop.permute.xlu0 %292 }
 0xc92   :  { %v295_v23 = vmul.f32 %v825_v3, %v293_v22 }
 0xc94   :  { %v296_v24 = vadd.f32 %v830_v5, %v295_v23 }
 0xc96   :  { %v297_v25 = vmax.f32 %v296_v24, 0.0 }
 0xc98   :  { %v298_v26 = vmul.f32 %v837_v8, %v297_v25 }
 0xc9a   :  { %v299_v27 = vsel %vm103_vm0, %v298_v26, 0.0 }
 0xc9b   :  { %300 = vadd.xlane.f32.xlu1 %v299_v27 }
 0xd24   :  { %v301_v28 = vpop.xlane.xlu1 %300 }
 0xd25   :  { %v302_v29 = vadd.f32 %v841_v12, %v301_v28 }
 0xd27   :  { %v307_v31 = vadd.f32 %v306_v21, %v302_v29  ;;  %v379_v21 = vstv %s661_s11 }
 0xd29   :  { %v309_v32 = vmul.f32 %v308_v30, %v307_v31  ;;  %v398_v31 = vstv %s663_s12 }
 0xd2b   :  { %v917_v33 = vadd.f32 %v309_v32, %v890_v43 }
 0xd2d   :  { %316 = vperm.xlu0 %683, %v917_v33  }
 0xda8   :  { %v317_v34 = vpop.permute.xlu0 %316 }
 0xda9   :  { %v319_v35 = vmul.f32 %v825_v3, %v317_v34 }
 0xdab   :  { %v320_v36 = vadd.f32 %v830_v5, %v319_v35 }
 0xdad   :  { %v321_v37 = vmax.f32 %v320_v36, 0.0 }
 0xdaf   :  { %v322_v38 = vmul.f32 %v837_v8, %v321_v37 }
 0xdb1   :  { %v323_v39 = vsel %vm103_vm0, %v322_v38, 0.0 }
 0xdb2   :  { %324 = vadd.xlane.f32.xlu1 %v323_v39 }
 0xe3b   :  { %v325_v41 = vpop.xlane.xlu1 %324 }
 0xe3c   :  { %v326_v42 = vadd.f32 %v841_v12, %v325_v41 }
 0xe3e   :  { %v328_v44 = vmul.f32 %v327_v40, %v326_v42 }
 0xe40   :  { %v329_v45 = vadd.f32 %v328_v44, %v917_v33 }
 0xe42   :  { %332 = vperm.xlu0 %683, %v329_v45  }
 0xebd   :  { %v333_v46 = vpop.permute.xlu0 %332 }
 0xebe   :  { %v335_v47 = vmul.f32 %v825_v3, %v333_v46 }
 0xec0   :  { %v336_v48 = vadd.f32 %v830_v5, %v335_v47 }
 0xec2   :  { %v337_v49 = vmax.f32 %v336_v48, 0.0 }
 0xec4   :  { %v338_v50 = vmul.f32 %v837_v8, %v337_v49 }
 0xec6   :  { %v339_v51 = vsel %vm103_vm0, %v338_v50, 0.0 }
 0xec7   :  { %340 = vadd.xlane.f32.xlu1 %v339_v51 }
 0xf50   :  { %v341_v52 = vpop.xlane.xlu1 %340 }
 0xf51   :  { %v342_v53 = vadd.f32 %v841_v12, %v341_v52 }
 0xf53   :  { %v343_v55 = vmul.f32 %v342_v53, %v327_v40  ;;  %v374_v63 = vmul.f32 2.0, %v342_v53 }
 0xf55   :  { %v344_v56 = vadd.f32 %v343_v55, %v917_v33  ;;  %v375_v6 = vadd.f32 %v374_v63, %v326_v42 }
 0xf57   :  { %347 = vperm.xlu0 %683, %v344_v56   ;;  %v429_v56 = vstv %s662_s13 }
 0xfd2   :  { %v348_v57 = vpop.permute.xlu0 %347 }
 0xfd3   :  { %v350_v58 = vmul.f32 %v825_v3, %v348_v57 }
 0xfd5   :  { %v351_v59 = vadd.f32 %v830_v5, %v350_v58 }
 0xfd7   :  { %v352_v60 = vmax.f32 %v351_v59, 0.0 }
 0xfd9   :  { %v353_v61 = vmul.f32 %v837_v8, %v352_v60 }
 0xfdb   :  { %v354_v62 = vsel %vm103_vm0, %v353_v61, 0.0 }
 0xfdc   :  { %355 = vadd.xlane.f32.xlu1 %v354_v62 }
0x1065   :  { %v356_v2 = vpop.xlane.xlu1 %355 }
0x1066   :  { %v357_v4 = vadd.f32 %v841_v12, %v356_v2 }
0x1068   :  { %v359_v7 = vmul.f32 %v358_v0, %v357_v4  ;;  %v376_v9 = vmul.f32 2.0, %v357_v4 }
0x106a   :  { %v360_v10 = vadd.f32 %v359_v7, %v917_v33  ;;  %v377_v11 = vadd.f32 %v376_v9, %v375_v6 }
0x106c   :  { %363 = vperm.xlu0 %683, %v360_v10  }
0x10e7   :  { %v364_v13 = vpop.permute.xlu0 %363 }
0x10e8   :  { %v366_v14 = vmul.f32 %v825_v3, %v364_v13  ;;  %v450_v13 = vstv %s664_s7 }
0x10ea   :  { %v367_v15 = vadd.f32 %v830_v5, %v366_v14 }
0x10ec   :  { %v368_v16 = vmax.f32 %v367_v15, 0.0 }
0x10ee   :  { %v369_v17 = vmul.f32 %v837_v8, %v368_v16 }
0x10f0   :  { %v370_v18 = vsel %vm103_vm0, %v369_v17, 0.0 }
0x10f1   :  { %371 = vadd.xlane.f32.xlu1 %v370_v18 }
0x117a   :  { %v372_v19 = vpop.xlane.xlu1 %371 }
0x117b   :  { %v373_v20 = vadd.f32 %v841_v12, %v372_v19 }
0x117d   :  { %v378_v22 = vadd.f32 %v377_v11, %v373_v20 }
0x117f   :  { %v380_v23 = vmul.f32 %v379_v21, %v378_v22 }
0x1181   :  { %v944_v24 = vadd.f32 %v380_v23, %v917_v33  ;;  %v469_v23 = vstv %s666_s14 }
0x1183   :  { %387 = vperm.xlu0 %683, %v944_v24  }
0x11fe   :  { %v388_v25 = vpop.permute.xlu0 %387 }
0x11ff   :  { %v390_v26 = vmul.f32 %v825_v3, %v388_v25 }
0x1201   :  { %v391_v27 = vadd.f32 %v830_v5, %v390_v26 }
0x1203   :  { %v392_v28 = vmax.f32 %v391_v27, 0.0 }
0x1205   :  { %v393_v29 = vmul.f32 %v837_v8, %v392_v28 }
0x1207   :  { %v394_v30 = vsel %vm103_vm0, %v393_v29, 0.0 }
0x1208   :  { %395 = vadd.xlane.f32.xlu1 %v394_v30 }
0x1291   :  { %v396_v32 = vpop.xlane.xlu1 %395 }
0x1292   :  { %v397_v34 = vadd.f32 %v841_v12, %v396_v32 }
0x1294   :  { %v399_v35 = vmul.f32 %v398_v31, %v397_v34 }
0x1296   :  { %v400_v36 = vadd.f32 %v399_v35, %v944_v24 }
0x1298   :  { %403 = vperm.xlu0 %683, %v400_v36  }
0x1313   :  { %v404_v37 = vpop.permute.xlu0 %403 }
0x1314   :  { %v406_v38 = vmul.f32 %v825_v3, %v404_v37 }
0x1316   :  { %v407_v39 = vadd.f32 %v830_v5, %v406_v38 }
0x1318   :  { %v408_v40 = vmax.f32 %v407_v39, 0.0 }
0x131a   :  { %v409_v41 = vmul.f32 %v837_v8, %v408_v40 }
0x131c   :  { %v410_v42 = vsel %vm103_vm0, %v409_v41, 0.0 }
0x131d   :  { %411 = vadd.xlane.f32.xlu1 %v410_v42 }
0x13a6   :  { %v412_v44 = vpop.xlane.xlu1 %411 }
0x13a7   :  { %v413_v45 = vadd.f32 %v841_v12, %v412_v44 }
0x13a9   :  { %v414_v46 = vmul.f32 %v413_v45, %v398_v31  ;;  %v445_v55 = vmul.f32 2.0, %v413_v45 }
0x13ab   :  { %v415_v47 = vadd.f32 %v414_v46, %v944_v24  ;;  %v446_v59 = vadd.f32 %v445_v55, %v397_v34 }
0x13ad   :  { %418 = vperm.xlu0 %683, %v415_v47  }
0x1428   :  { %v419_v48 = vpop.permute.xlu0 %418 }
0x1429   :  { %v421_v49 = vmul.f32 %v825_v3, %v419_v48  ;;  %v500_v48 = vstv %s665_s1 }
0x142b   :  { %v422_v50 = vadd.f32 %v830_v5, %v421_v49 }
0x142d   :  { %v423_v51 = vmax.f32 %v422_v50, 0.0 }
0x142f   :  { %v424_v52 = vmul.f32 %v837_v8, %v423_v51 }
0x1431   :  { %v425_v53 = vsel %vm103_vm0, %v424_v52, 0.0 }
0x1432   :  { %426 = vadd.xlane.f32.xlu1 %v425_v53 }
0x14bb   :  { %v427_v57 = vpop.xlane.xlu1 %426 }
0x14bc   :  { %v428_v58 = vadd.f32 %v841_v12, %v427_v57 }
0x14be   :  { %v430_v60 = vmul.f32 %v429_v56, %v428_v58  ;;  %v447_v61 = vmul.f32 2.0, %v428_v58 }
0x14c0   :  { %v431_v62 = vadd.f32 %v430_v60, %v944_v24  ;;  %v448_v63 = vadd.f32 %v447_v61, %v446_v59 }
0x14c2   :  { %434 = vperm.xlu0 %683, %v431_v62  }
0x153d   :  { %v435_v0 = vpop.permute.xlu0 %434 }
0x153e   :  { %v437_v2 = vmul.f32 %v825_v3, %v435_v0 }
0x1540   :  { %v438_v4 = vadd.f32 %v830_v5, %v437_v2  ;;  %v521_v2 = vstv %s667_s0 }
0x1542   :  { %v439_v6 = vmax.f32 %v438_v4, 0.0 }
0x1544   :  { %v440_v7 = vmul.f32 %v837_v8, %v439_v6 }
0x1546   :  { %v441_v9 = vsel %vm103_vm0, %v440_v7, 0.0 }
0x1547   :  { %442 = vadd.xlane.f32.xlu1 %v441_v9 }
0x15d0   :  { %v443_v10 = vpop.xlane.xlu1 %442 }
0x15d1   :  { %v444_v11 = vadd.f32 %v841_v12, %v443_v10 }
0x15d3   :  { %v449_v14 = vadd.f32 %v448_v63, %v444_v11 }
0x15d5   :  { %v451_v15 = vmul.f32 %v450_v13, %v449_v14 }
0x15d7   :  { %v971_v16 = vadd.f32 %v451_v15, %v944_v24 }
0x15d9   :  { %458 = vperm.xlu0 %683, %v971_v16  }
0x1654   :  { %v459_v17 = vpop.permute.xlu0 %458 }
0x1655   :  { %v461_v18 = vmul.f32 %v825_v3, %v459_v17  ;;  %v540_v17 = vstv %s669_s15 }
0x1657   :  { %v462_v19 = vadd.f32 %v830_v5, %v461_v18 }
0x1659   :  { %v463_v20 = vmax.f32 %v462_v19, 0.0 }
0x165b   :  { %v464_v21 = vmul.f32 %v837_v8, %v463_v20 }
0x165d   :  { %v465_v22 = vsel %vm103_vm0, %v464_v21, 0.0 }
0x165e   :  { %466 = vadd.xlane.f32.xlu1 %v465_v22 }
0x16e7   :  { %v467_v25 = vpop.xlane.xlu1 %466 }
0x16e8   :  { %v468_v26 = vadd.f32 %v841_v12, %v467_v25 }
0x16ea   :  { %v470_v27 = vmul.f32 %v469_v23, %v468_v26 }
0x16ec   :  { %v471_v28 = vadd.f32 %v470_v27, %v971_v16 }
0x16ee   :  { %474 = vperm.xlu0 %683, %v471_v28  }
0x1769   :  { %v475_v29 = vpop.permute.xlu0 %474 }
0x176a   :  { %v477_v30 = vmul.f32 %v825_v3, %v475_v29 }
0x176c   :  { %v478_v31 = vadd.f32 %v830_v5, %v477_v30 }
0x176e   :  { %v479_v32 = vmax.f32 %v478_v31, 0.0 }
0x1770   :  { %v480_v34 = vmul.f32 %v837_v8, %v479_v32 }
0x1772   :  { %v481_v35 = vsel %vm103_vm0, %v480_v34, 0.0 }
0x1773   :  { %482 = vadd.xlane.f32.xlu1 %v481_v35 }
0x17fc   :  { %v483_v36 = vpop.xlane.xlu1 %482 }
0x17fd   :  { %v484_v37 = vadd.f32 %v841_v12, %v483_v36 }
0x17ff   :  { %v485_v38 = vmul.f32 %v484_v37, %v469_v23  ;;  %v516_v47 = vmul.f32 2.0, %v484_v37 }
0x1801   :  { %v486_v39 = vadd.f32 %v485_v38, %v971_v16  ;;  %v517_v51 = vadd.f32 %v516_v47, %v468_v26 }
0x1803   :  { %489 = vperm.xlu0 %683, %v486_v39  }
0x187e   :  { %v490_v40 = vpop.permute.xlu0 %489 }
0x187f   :  { %v492_v41 = vmul.f32 %v825_v3, %v490_v40 }
0x1881   :  { %v493_v42 = vadd.f32 %v830_v5, %v492_v41  ;;  %v571_v41 = vstv %s668_s16 }
0x1883   :  { %v494_v44 = vmax.f32 %v493_v42, 0.0 }
0x1885   :  { %v495_v45 = vmul.f32 %v837_v8, %v494_v44 }
0x1887   :  { %v496_v46 = vsel %vm103_vm0, %v495_v45, 0.0 }
0x1888   :  { %497 = vadd.xlane.f32.xlu1 %v496_v46 }
0x1911   :  { %v498_v49 = vpop.xlane.xlu1 %497 }
0x1912   :  { %v499_v50 = vadd.f32 %v841_v12, %v498_v49 }
0x1914   :  { %v501_v52 = vmul.f32 %v500_v48, %v499_v50  ;;  %v518_v53 = vmul.f32 2.0, %v499_v50 }
0x1916   :  { %v502_v55 = vadd.f32 %v501_v52, %v971_v16  ;;  %v519_v56 = vadd.f32 %v518_v53, %v517_v51 }
0x1918   :  { %505 = vperm.xlu0 %683, %v502_v55  }
0x1993   :  { %v506_v57 = vpop.permute.xlu0 %505 }
0x1994   :  { %v508_v58 = vmul.f32 %v825_v3, %v506_v57 }
0x1996   :  { %v509_v59 = vadd.f32 %v830_v5, %v508_v58 }
0x1998   :  { %v510_v60 = vmax.f32 %v509_v59, 0.0 }
0x199a   :  { %v511_v61 = vmul.f32 %v837_v8, %v510_v60 }
0x199c   :  { %v512_v62 = vsel %vm103_vm0, %v511_v61, 0.0 }
0x199d   :  { %513 = vadd.xlane.f32.xlu1 %v512_v62 }
0x1a26   :  { %v514_v63 = vpop.xlane.xlu1 %513 }
0x1a27   :  { %v515_v0 = vadd.f32 %v841_v12, %v514_v63 }
0x1a29   :  { %v520_v4 = vadd.f32 %v519_v56, %v515_v0 }
0x1a2b   :  { %v522_v6 = vmul.f32 %v521_v2, %v520_v4 }
0x1a2d   :  { %v998_v7 = vadd.f32 %v522_v6, %v971_v16 }
0x1a2f   :  { %529 = vperm.xlu0 %683, %v998_v7  }
0x1aaa   :  { %v530_v9 = vpop.permute.xlu0 %529 }
0x1aab   :  { %v532_v10 = vmul.f32 %v825_v3, %v530_v9 }
0x1aad   :  { %v533_v11 = vadd.f32 %v830_v5, %v532_v10 }
0x1aaf   :  { %v534_v13 = vmax.f32 %v533_v11, 0.0 }
0x1ab1   :  { %v535_v14 = vmul.f32 %v837_v8, %v534_v13 }
0x1ab3   :  { %v536_v15 = vsel %vm103_vm0, %v535_v14, 0.0 }
0x1ab4   :  { %537 = vadd.xlane.f32.xlu1 %v536_v15 }
0x1b3d   :  { %v538_v18 = vpop.xlane.xlu1 %537 }
0x1b3e   :  { %v539_v19 = vadd.f32 %v841_v12, %v538_v18 }
0x1b40   :  { %v541_v20 = vmul.f32 %v540_v17, %v539_v19 }
0x1b42   :  { %v542_v21 = vadd.f32 %v541_v20, %v998_v7 }
0x1b44   :  { %545 = vperm.xlu0 %683, %v542_v21  }
0x1bbf   :  { %v546_v22 = vpop.permute.xlu0 %545 }
0x1bc0   :  { %v548_v23 = vmul.f32 %v825_v3, %v546_v22 }
0x1bc2   :  { %v549_v25 = vadd.f32 %v830_v5, %v548_v23 }
0x1bc4   :  { %v550_v26 = vmax.f32 %v549_v25, 0.0 }
0x1bc6   :  { %v551_v27 = vmul.f32 %v837_v8, %v550_v26 }
0x1bc8   :  { %v552_v28 = vsel %vm103_vm0, %v551_v27, 0.0 }
0x1bc9   :  { %553 = vadd.xlane.f32.xlu1 %v552_v28 }
0x1c52   :  { %v554_v29 = vpop.xlane.xlu1 %553 }
0x1c53   :  { %v555_v30 = vadd.f32 %v841_v12, %v554_v29 }
0x1c55   :  { %v556_v31 = vmul.f32 %v555_v30, %v540_v17  ;;  %v587_v40 = vmul.f32 2.0, %v555_v30 }
0x1c57   :  { %v557_v32 = vadd.f32 %v556_v31, %v998_v7  ;;  %v588_v45 = vadd.f32 %v587_v40, %v539_v19 }
0x1c59   :  { %560 = vperm.xlu0 %683, %v557_v32  }
0x1cd4   :  { %v561_v34 = vpop.permute.xlu0 %560 }
0x1cd5   :  { %v563_v35 = vmul.f32 %v825_v3, %v561_v34 }
0x1cd7   :  { %v564_v36 = vadd.f32 %v830_v5, %v563_v35 }
0x1cd9   :  { %v565_v37 = vmax.f32 %v564_v36, 0.0 }
0x1cdb   :  { %v566_v38 = vmul.f32 %v837_v8, %v565_v37 }
0x1cdd   :  { %v567_v39 = vsel %vm103_vm0, %v566_v38, 0.0 }
0x1cde   :  { %568 = vadd.xlane.f32.xlu1 %v567_v39 }
0x1d67   :  { %v569_v42 = vpop.xlane.xlu1 %568 }
0x1d68   :  { %v570_v44 = vadd.f32 %v841_v12, %v569_v42 }
0x1d6a   :  { %v572_v46 = vmul.f32 %v571_v41, %v570_v44  ;;  %v589_v47 = vmul.f32 2.0, %v570_v44 }
0x1d6c   :  { %v573_v48 = vadd.f32 %v572_v46, %v998_v7  ;;  %v590_v49 = vadd.f32 %v589_v47, %v588_v45 }
0x1d6e   :  { %576 = vperm.xlu0 %683, %v573_v48  }
0x1d72   :  { %595 = vrot.lane.b32.xlu0 %v863_v54, %s751_s17 }
0x1d76   :  { %601 = vrot.lane.b32.xlu0 %v917_v33, %s752_s18 }
0x1d7a   :  { %604 = vrot.lane.b32.xlu0 %v944_v24, %s753_s19 }
0x1d7e   :  { %607 = vrot.lane.b32.xlu0 %v971_v16, %s754_s20  ;;  %v592_v16 = vstv %s670_s22 }
0x1d82   :  { %610 = vrot.lane.b32.xlu0 %v998_v7, %s755_s2 }
0x1de9   :  { %v577_v50 = vpop.permute.xlu0 %576 }
0x1dea   :  { %v579_v51 = vmul.f32 %v825_v3, %v577_v50 }
0x1dec   :  { %v580_v52 = vadd.f32 %v830_v5, %v579_v51 }
0x1ded   :  { %v596_v5 = vpop.permute.xlu0 %595 }
0x1dee   :  { %v581_v53 = vmax.f32 %v580_v52, 0.0  ;;  %v618_v60 = vsel %vm617_vm1, %v819_v1, %v596_v5 }
0x1df0   :  { %v582_v54 = vmul.f32 %v837_v8, %v581_v53 }
0x1df1   :  { %v602_v58 = vpop.permute.xlu0 %601 }
0x1df2   :  { %v583_v55 = vsel %vm103_vm0, %v582_v54, 0.0 }
0x1df3   :  { %584 = vadd.xlane.f32.xlu1 %v583_v55 }
0x1df5   :  { %v605_v8 = vpop.permute.xlu0 %604 }
0x1df9   :  { %v608_v61 = vpop.permute.xlu0 %607 }
0x1dfd   :  { %v611_v63 = vpop.permute.xlu0 %610 }
0x1e04   :  { %598 = vrot.lane.b32.xlu1 %v890_v43, %s756_s21 }
0x1e7c   :  { %v585_v33 = vpop.xlane.xlu1 %584 }
0x1e7d   :  { %v586_v24 = vadd.f32 %v841_v12, %v585_v33 }
0x1e7f   :  { %v591_v56 = vadd.f32 %v590_v49, %v586_v24 }
0x1e80   :  { %v599_v59 = vpop.permute.xlu1 %598 }
0x1e81   :  { %v593_v57 = vmul.f32 %v592_v16, %v591_v56  ;;  %v620_v43 = vsel %vm619_vm2, %v618_v60, %v599_v59 }
0x1e82   :  { %v622_v12 = vsel %vm621_vm3, %v620_v43, %v602_v58 }
0x1e83   :  { %v594_v3 = vadd.f32 %v593_v57, %v998_v7  ;;  %v624_v62 = vsel %vm623_vm4, %v622_v12, %v605_v8 }
0x1e84   :  { %v626_v0 = vsel %vm625_vm5, %v624_v62, %v608_v61 }
0x1e85   :  { %614 = vrot.lane.b32.xlu0 %v594_v3, %s757_s23  ;;  %v628_v4 = vsel %vm627_vm6, %v626_v0, %v611_v63 }
0x1ef7   :  { %v615_v2 = vpop.permute.xlu0 %614 }
0x1ef8   :  { %v630_v6 = vsel %vm629_vm7, %v628_v4, %v615_v2 }
0x1ef9   :  { %632 = vst.msk [vmem:[#allocation9] sm:$0x3] %vm631_vm8, %v630_v6 }
0x1efa   :  { %732 = shalt.err (!%p729_p5)
}
0x1efb   :  { %642 = dma.vmem_to_hbm [thread:$0]  %s640_s24, 32, %s1043_s8, [#allocation4]  }
0x1efc   :  { %745 = dma.done.wait [#allocation4], 32  }
0x1efd   :  { %746 = vsyncadd [#allocation4], 4294967264 }
0x1efe   :  { %646 = vsyncpa [#allocation4], 1 }
0x1eff   :  { %647 = vsyncpa [#allocation5], 1 }
0x1f00   :  { %648 = vsyncpa [#allocation7], 1 }

</bundles_post_ra>
